<compile_context>
chip_gen: v7x
topology: tpu7x:2x2x1
jax: 0.10.0
libtpu: 0.0.40
codegen_flags: <defaults>
</compile_context>

<pallas_src>
import math
import functools

import jax
import jax.numpy as jnp
from jax.experimental import pallas as pl
from jax.experimental.pallas import tpu as pltpu


# ----------------------------- helpers -----------------------------

def _layernorm(x, g, b, eps=1e-5):
    mu = jnp.mean(x, axis=-1, keepdims=True)
    var = jnp.mean(jnp.square(x - mu), axis=-1, keepdims=True)
    return (x - mu) * jax.lax.rsqrt(var + eps) * g + b


def _wspec(shape):
    """Full-array (weight) BlockSpec for a batch-gridded kernel."""
    if len(shape) == 2:
        return pl.BlockSpec(shape, lambda b: (0, 0))
    return pl.BlockSpec(shape, lambda b: (0, 0, 0))


# ------------------ kernel 1: embedding + positional encoding ------------------

def _embed_pe_kernel(x_ref, w_ref, b_ref, pe_ref, o_ref):
    x = x_ref[0]                                                    # (S, F)
    y = jnp.dot(x, w_ref[...], preferred_element_type=jnp.float32)  # (S, D)
    o_ref[0] = y + b_ref[...] + pe_ref[...]


def pallas_embed_pe(x, w, b, pe):
    B, S, F = x.shape
    D = w.shape[1]
    return pl.pallas_call(
        _embed_pe_kernel,
        out_shape=jax.ShapeDtypeStruct((B, S, D), jnp.float32),
        grid=(B,),
        in_specs=[
            pl.BlockSpec((1, S, F), lambda b: (b, 0, 0)),
            _wspec((F, D)), _wspec((1, D)), _wspec((S, D)),
        ],
        out_specs=pl.BlockSpec((1, S, D), lambda b: (b, 0, 0)),
        compiler_params=pltpu.CompilerParams(dimension_semantics=("parallel",)),
    )(x, w, b, pe)


# ------------------ kernel 2: fused transformer encoder layer ------------------

def _encoder_layer_kernel(h_ref, wqkv_ref, bqkv_ref, wo_ref, bo_ref,
                          w1_ref, b1_ref, w2_ref, b2_ref,
                          ln1g_ref, ln1b_ref, ln2g_ref, ln2b_ref,
                          o_ref, *, num_heads, head_dim):
    D = h_ref.shape[2]
    x = h_ref[0]                                                    # (S, D)

    # ---- multi-head self-attention (eval: no dropout, no mask) ----
    qkv = jnp.dot(x, wqkv_ref[...], preferred_element_type=jnp.float32) + bqkv_ref[...]
    q = qkv[:, 0:D]
    k = qkv[:, D:2 * D]
    v = qkv[:, 2 * D:3 * D]
    wo = wo_ref[...]
    scale = 1.0 / math.sqrt(head_dim)

    # Per-head attention with a small static loop; heads are merged through
    # row-blocks of the output projection so no concat / masked stores occur.
    acc = jnp.zeros_like(x)                                         # (S, D) f32
    for hh in range(num_heads):
        lo = hh * head_dim
        hi = lo + head_dim
        qh = q[:, lo:hi] * scale
        kh = k[:, lo:hi]
        vh = v[:, lo:hi]
        # contract last dims directly (no explicit transpose through the XLU)
        s = jax.lax.dot_general(qh, kh, (((1,), (1,)), ((), ())),
                                preferred_element_type=jnp.float32)  # (S, S)
        s = s - jnp.max(s, axis=-1, keepdims=True)
        e = jnp.exp(s)
        p = e / jnp.sum(e, axis=-1, keepdims=True)
        head = jnp.dot(p, vh, preferred_element_type=jnp.float32)    # (S, hd)
        acc = acc + jnp.dot(head, wo[lo:hi, :], preferred_element_type=jnp.float32)
    attn = acc + bo_ref[...]

    h1 = _layernorm(x + attn, ln1g_ref[...], ln1b_ref[...])

    # ---- feed-forward (ReLU) ----
    ff = jnp.dot(h1, w1_ref[...], preferred_element_type=jnp.float32) + b1_ref[...]
    ff = jnp.maximum(ff, 0.0)
    ff = jnp.dot(ff, w2_ref[...], preferred_element_type=jnp.float32) + b2_ref[...]

    o_ref[0] = _layernorm(h1 + ff, ln2g_ref[...], ln2b_ref[...])


def pallas_encoder_layer(h, lp, num_heads):
    B, S, D = h.shape
    head_dim = D // num_heads
    return pl.pallas_call(
        functools.partial(_encoder_layer_kernel,
                          num_heads=num_heads, head_dim=head_dim),
        out_shape=jax.ShapeDtypeStruct((B, S, D), jnp.float32),
        grid=(B,),
        in_specs=[
            pl.BlockSpec((1, S, D), lambda b: (b, 0, 0)),
            _wspec((D, 3 * D)), _wspec((1, 3 * D)),
            _wspec((D, D)), _wspec((1, D)),
            _wspec((D, 4 * D)), _wspec((1, 4 * D)),
            _wspec((4 * D, D)), _wspec((1, D)),
            _wspec((1, D)), _wspec((1, D)), _wspec((1, D)), _wspec((1, D)),
        ],
        out_specs=pl.BlockSpec((1, S, D), lambda b: (b, 0, 0)),
        compiler_params=pltpu.CompilerParams(dimension_semantics=("parallel",)),
    )(h, lp["wqkv"], lp["bqkv"], lp["wo"], lp["bo"],
      lp["w1"], lp["b1"], lp["w2"], lp["b2"],
      lp["ln1_g"], lp["ln1_b"], lp["ln2_g"], lp["ln2_b"])


# -------- kernel 3: feature norm + pooling + all prediction pathways --------

def _tail_kernel(h_ref, fng_ref, fnb_ref,
                 fa1w_ref, fa1b_ref, fa2w_ref, fa2b_ref,
                 hw1_ref, hb1_ref, hw2_ref, hb2_ref, hw3_ref, hb3_ref,
                 dw0_ref, db0_ref, dw1_ref, db1_ref,
                 dw2_ref, db2_ref, dw3_ref, db3_ref,
                 o_ref):
    S, D = h_ref.shape[1], h_ref.shape[2]
    x = _layernorm(h_ref[0], fng_ref[...], fnb_ref[...])            # (S, D)

    # pooling: last token / mean over seq / feature-attention weighted sum
    last = x[S - 1:S, :]                                            # (1, D)
    avg = jnp.mean(x, axis=0, keepdims=True)                        # (1, D)
    a1 = jnp.maximum(
        jnp.dot(x, fa1w_ref[...], preferred_element_type=jnp.float32) + fa1b_ref[...],
        0.0)                                                        # (S, D/2)
    sc = jnp.dot(a1, fa2w_ref[...], preferred_element_type=jnp.float32) + fa2b_ref[...]
    sc = sc - jnp.max(sc, axis=0, keepdims=True)                    # (S, 1)
    e = jnp.exp(sc)
    w = e / jnp.sum(e, axis=0, keepdims=True)                       # softmax over seq
    attnh = jnp.sum(x * w, axis=0, keepdims=True)                   # (1, D)

    # combined = [last | avg | attnh]: consume it via row-blocks of the (3D, N)
    # weights instead of materializing a (1, 3D) lane concatenation.
    def proj_combined(w_full, bias):
        return (jnp.dot(last, w_full[0:D, :], preferred_element_type=jnp.float32)
                + jnp.dot(avg, w_full[D:2 * D, :], preferred_element_type=jnp.float32)
                + jnp.dot(attnh, w_full[2 * D:3 * D, :], preferred_element_type=jnp.float32)
                + bias)

    # three identical ReLU heads: volatility, price_change, spread
    head_out = []
    for i in range(3):
        t = jnp.maximum(proj_combined(hw1_ref[i], hb1_ref[i]), 0.0)            # (1, D)
        t = jnp.maximum(jnp.dot(t, hw2_ref[i], preferred_element_type=jnp.float32)
                        + hb2_ref[i], 0.0)                                     # (1, D/2)
        head_out.append(jnp.dot(t, hw3_ref[i], preferred_element_type=jnp.float32)
                        + hb3_ref[i])                                          # (1, 1)

    # direction pathway: Linear (+folded eval BatchNorm) -> LeakyReLU(0.1) x3 -> Linear
    t = proj_combined(dw0_ref[...], db0_ref[...])
    t = jnp.where(t > 0.0, t, 0.1 * t)
    t = jnp.dot(t, dw1_ref[...], preferred_element_type=jnp.float32) + db1_ref[...]
    t = jnp.where(t > 0.0, t, 0.1 * t)
    t = jnp.dot(t, dw2_ref[...], preferred_element_type=jnp.float32) + db2_ref[...]
    t = jnp.where(t > 0.0, t, 0.1 * t)
    logits = jnp.dot(t, dw3_ref[...], preferred_element_type=jnp.float32) + db3_ref[...]
    prob = 1.0 / (1.0 + jnp.exp(-logits))

    # single lane-dense store: [logits, prob, volatility, price_change, spread, 0,0,0]
    col = jax.lax.broadcasted_iota(jnp.int32, (1, 8), 1)
    out = (jnp.where(col == 0, logits, 0.0)
           + jnp.where(col == 1, prob, 0.0)
           + jnp.where(col == 2, head_out[0], 0.0)
           + jnp.where(col == 3, head_out[1], 0.0)
           + jnp.where(col == 4, head_out[2], 0.0))
    o_ref[0] = out


def pallas_tail(h, p):
    B, S, D = h.shape
    D2, D4 = D // 2, D // 4
    return pl.pallas_call(
        _tail_kernel,
        out_shape=jax.ShapeDtypeStruct((B, 1, 8), jnp.float32),
        grid=(B,),
        in_specs=[
            pl.BlockSpec((1, S, D), lambda b: (b, 0, 0)),
            _wspec((1, D)), _wspec((1, D)),
            _wspec((D, D2)), _wspec((1, D2)), _wspec((D2, 1)), _wspec((1, 1)),
            _wspec((3, 3 * D, D)), _wspec((3, 1, D)),
            _wspec((3, D, D2)), _wspec((3, 1, D2)),
            _wspec((3, D2, 1)), _wspec((3, 1, 1)),
            _wspec((3 * D, D)), _wspec((1, D)),
            _wspec((D, D2)), _wspec((1, D2)),
            _wspec((D2, D4)), _wspec((1, D4)),
            _wspec((D4, 1)), _wspec((1, 1)),
        ],
        out_specs=pl.BlockSpec((1, 1, 8), lambda b: (b, 0, 0)),
        compiler_params=pltpu.CompilerParams(dimension_semantics=("parallel",)),
    )(h, p["fn_g"], p["fn_b"],
      p["fa1_w"], p["fa1_b"], p["fa2_w"], p["fa2_b"],
      p["hw1"], p["hb1"], p["hw2"], p["hb2"], p["hw3"], p["hb3"],
      p["dw0"], p["db0"], p["dw1"], p["db1"],
      p["dw2"], p["db2"], p["dw3"], p["db3"])


# ----------------------------- parameters -----------------------------

def init_params(key, input_dim, hidden_dim, num_layers):
    """Raw parameters (weights stored (in, out); biases 1-D; BN running stats)."""
    D = hidden_dim
    keys = iter(jax.random.split(key, 128))

    def dense(k, fan_in, fan_out):
        kw, kb = jax.random.split(k)
        w = jax.random.normal(kw, (fan_in, fan_out), jnp.float32) * 0.02
        b = jax.random.uniform(kb, (fan_out,), jnp.float32, -0.05, 0.05)
        return w, b

    p = {}
    p["emb_w"], p["emb_b"] = dense(next(keys), input_dim, D)

    layers = []
    for _ in range(num_layers):
        l = {}
        l["wqkv"], l["bqkv"] = dense(next(keys), D, 3 * D)
        l["wo"], l["bo"] = dense(next(keys), D, D)
        l["w1"], l["b1"] = dense(next(keys), D, 4 * D)
        l["w2"], l["b2"] = dense(next(keys), 4 * D, D)
        l["ln1_g"], l["ln1_b"] = jnp.ones((D,)), jnp.zeros((D,))
        l["ln2_g"], l["ln2_b"] = jnp.ones((D,)), jnp.zeros((D,))
        layers.append(l)
    p["layers"] = layers

    p["fn_g"], p["fn_b"] = jnp.ones((D,)), jnp.zeros((D,))
    p["fa1_w"], p["fa1_b"] = dense(next(keys), D, D // 2)
    p["fa2_w"], p["fa2_b"] = dense(next(keys), D // 2, 1)

    def relu_mlp():
        ws = {}
        ws["w1"], ws["b1"] = dense(next(keys), 3 * D, D)
        ws["w2"], ws["b2"] = dense(next(keys), D, D // 2)
        ws["w3"], ws["b3"] = dense(next(keys), D // 2, 1)
        return ws

    p["volatility"] = relu_mlp()
    p["price_change"] = relu_mlp()
    p["spread"] = relu_mlp()

    dp = {}
    dims = [3 * D, D, D // 2, D // 4, 1]
    for i in range(4):
        w, b = dense(next(keys), dims[i], dims[i + 1])
        dp[f"w{i}"], dp[f"b{i}"] = w, b
        if i < 3:
            n = dims[i + 1]
            dp[f"bn{i}_g"], dp[f"bn{i}_b"] = jnp.ones((n,)), jnp.zeros((n,))
            dp[f"bn{i}_m"], dp[f"bn{i}_v"] = jnp.zeros((n,)), jnp.ones((n,))
    p["direction"] = dp
    return p


def make_positional_encoding(seq_len, d_model):
    pos = jnp.arange(seq_len, dtype=jnp.float32)[:, None]
    div = jnp.exp(jnp.arange(0, d_model, 2, dtype=jnp.float32)
                  * (-math.log(10000.0) / d_model))
    pe = jnp.zeros((seq_len, d_model), jnp.float32)
    pe = pe.at[:, 0::2].set(jnp.sin(pos * div))
    pe = pe.at[:, 1::2].set(jnp.cos(pos * div))
    return pe


def prepare_params(raw, seq_len):
    """Hoisted, kernel-ready params: PE precomputed, biases as (1,N) rows,
    the 3 prediction heads stacked, eval BatchNorm folded into Linears."""
    D = raw["emb_w"].shape[1]
    row = lambda v: v.reshape(1, -1)

    kp = {"emb_w": raw["emb_w"], "emb_b": row(raw["emb_b"]),
          "pe": make_positional_encoding(seq_len, D)}

    layers = []
    for l in raw["layers"]:
        layers.append({
            "wqkv": l["wqkv"], "bqkv": row(l["bqkv"]),
            "wo": l["wo"], "bo": row(l["bo"]),
            "w1": l["w1"], "b1": row(l["b1"]),
            "w2": l["w2"], "b2": row(l["b2"]),
            "ln1_g": row(l["ln1_g"]), "ln1_b": row(l["ln1_b"]),
            "ln2_g": row(l["ln2_g"]), "ln2_b": row(l["ln2_b"]),
        })
    kp["layers"] = layers

    kp["fn_g"], kp["fn_b"] = row(raw["fn_g"]), row(raw["fn_b"])
    kp["fa1_w"], kp["fa1_b"] = raw["fa1_w"], row(raw["fa1_b"])
    kp["fa2_w"], kp["fa2_b"] = raw["fa2_w"], row(raw["fa2_b"])

    heads = [raw["volatility"], raw["price_change"], raw["spread"]]
    kp["hw1"] = jnp.stack([h["w1"] for h in heads])
    kp["hb1"] = jnp.stack([row(h["b1"]) for h in heads])
    kp["hw2"] = jnp.stack([h["w2"] for h in heads])
    kp["hb2"] = jnp.stack([row(h["b2"]) for h in heads])
    kp["hw3"] = jnp.stack([h["w3"] for h in heads])
    kp["hb3"] = jnp.stack([row(h["b3"]) for h in heads])

    dp = raw["direction"]
    for i in range(3):
        s = dp[f"bn{i}_g"] / jnp.sqrt(dp[f"bn{i}_v"] + 1e-5)
        kp[f"dw{i}"] = dp[f"w{i}"] * s[None, :]
        kp[f"db{i}"] = row((dp[f"b{i}"] - dp[f"bn{i}_m"]) * s + dp[f"bn{i}_b"])
    kp["dw3"], kp["db3"] = dp["w3"], row(dp["b3"])
    return kp


# ------------------------------- forward -------------------------------

def forward(kp, x, *, num_heads):
    h = pallas_embed_pe(x, kp["emb_w"], kp["emb_b"], kp["pe"])       # (B, S, D)
    for lp in kp["layers"]:
        h = pallas_encoder_layer(h, lp, num_heads)                   # fused layer
    tail = pallas_tail(h, kp)                                        # (B, 1, 8)
    flat = tail[:, 0, :]
    return {
        "direction_logits": flat[:, 0:1],
        "direction_prob":   flat[:, 1:2],
        "volatility":       flat[:, 2:3],
        "price_change":     flat[:, 3:4],
        "spread":           flat[:, 4:5],
    }


# -------------------------------- main --------------------------------

if __name__ == "__main__":
    INPUT_DIM = 16
    HIDDEN = 32
    HEADS = 4          # hidden_dim must be divisible by num_heads
    LAYERS = 2
    B, S = 2, 8

    key = jax.random.PRNGKey(0)
    pkey, xkey = jax.random.split(key)
    raw_params = init_params(pkey, INPUT_DIM, HIDDEN, LAYERS)
    params = prepare_params(raw_params, S)          # hoisted once, outside jit
    x = jax.random.normal(xkey, (B, S, INPUT_DIM), jnp.float32)

    fwd = jax.jit(functools.partial(forward, num_heads=HEADS))
    out = fwd(params, x)
    jax.block_until_ready(out)

    assert out["direction_logits"].shape == (B, 1)
    assert out["direction_prob"].shape == (B, 1)
    assert out["volatility"].shape == (B, 1)
    assert out["price_change"].shape == (B, 1)
    assert out["spread"].shape == (B, 1)
    print("KERNEL_OK")
</pallas_src>

<mosaic_0001>
module attributes {stable_mosaic.version = 11 : i64} {
  func.func @_embed_pe_kernel(%arg0: i32, %arg1: memref<1x8x16xf32, #tpu.memory_space<vmem>>, %arg2: memref<16x32xf32, #tpu.memory_space<vmem>>, %arg3: memref<1x32xf32, #tpu.memory_space<vmem>>, %arg4: memref<8x32xf32, #tpu.memory_space<vmem>>, %arg5: memref<1x8x32xf32, #tpu.memory_space<vmem>>) attributes {dimension_semantics = [#tpu.dimension_semantics<parallel>], iteration_bounds = array<i64: 2>, scalar_prefetch = 0 : i64, scratch_operands = 0 : i64, tpu.core_type = #tpu.core_type<tc>, window_params = [{transform_indices = @transform_0, window_bounds = array<i64: 1, 8, 16>}, {pipeline_mode = #tpu.pipeline_mode<synchronous>, transform_indices = @transform_1, window_bounds = array<i64: 16, 32>}, {pipeline_mode = #tpu.pipeline_mode<synchronous>, transform_indices = @transform_2, window_bounds = array<i64: 1, 32>}, {pipeline_mode = #tpu.pipeline_mode<synchronous>, transform_indices = @transform_3, window_bounds = array<i64: 8, 32>}, {transform_indices = @transform_4, window_bounds = array<i64: 1, 8, 32>}]} {
    %c0 = arith.constant 0 : index
    %c0_0 = arith.constant 0 : index
    %c0_1 = arith.constant 0 : index
    %0 = vector.load %arg1[%c0, %c0_0, %c0_1] : memref<1x8x16xf32, #tpu.memory_space<vmem>>, vector<1x8x16xf32>
    %1 = vector.shape_cast %0 : vector<1x8x16xf32> to vector<8x16xf32>
    %c0_2 = arith.constant 0 : index
    %c0_3 = arith.constant 0 : index
    %2 = vector.load %arg2[%c0_2, %c0_3] : memref<16x32xf32, #tpu.memory_space<vmem>>, vector<16x32xf32>
    %cst = arith.constant dense<0.000000e+00> : vector<8x32xf32>
    %3 = tpu.matmul %1, %2, %cst {dimension_numbers = #tpu.dot_dimension_numbers<[1], [0], [0], [1], [0, 0, 1, 1], [], []>} : vector<8x16xf32>, vector<16x32xf32>, vector<8x32xf32> -> vector<8x32xf32>
    %c0_4 = arith.constant 0 : index
    %c0_5 = arith.constant 0 : index
    %4 = vector.load %arg3[%c0_4, %c0_5] : memref<1x32xf32, #tpu.memory_space<vmem>>, vector<1x32xf32>
    %5 = vector.broadcast %4 : vector<1x32xf32> to vector<8x32xf32>
    %6 = arith.addf %3, %5 : vector<8x32xf32>
    %c0_6 = arith.constant 0 : index
    %c0_7 = arith.constant 0 : index
    %7 = vector.load %arg4[%c0_6, %c0_7] : memref<8x32xf32, #tpu.memory_space<vmem>>, vector<8x32xf32>
    %8 = arith.addf %6, %7 : vector<8x32xf32>
    %c0_8 = arith.constant 0 : index
    %c0_9 = arith.constant 0 : index
    %c0_10 = arith.constant 0 : index
    %9 = vector.load %arg5[%c0_8, %c0_9, %c0_10] : memref<1x8x32xf32, #tpu.memory_space<vmem>>, vector<1x8x32xf32>
    %10 = vector.shape_cast %9 : vector<1x8x32xf32> to vector<8x32xf32>
    %11 = vector.shape_cast %8 : vector<8x32xf32> to vector<1x8x32xf32>
    tpu.vector_store %arg5[%c0_8, %c0_9, %c0_10], %11 {strides = array<i32>} : memref<1x8x32xf32, #tpu.memory_space<vmem>>, vector<1x8x32xf32>,
    return
  }
  func.func @transform_0(%arg0: i32) -> (i32, i32, i32) {
    %c0_i32 = arith.constant 0 : i32
    %c0_i32_0 = arith.constant 0 : i32
    %c0_i32_1 = arith.constant 0 : i32
    return %arg0, %c0_i32, %c0_i32_0 : i32, i32, i32
  }
  func.func @transform_1(%arg0: i32) -> (i32, i32) {
    %c0_i32 = arith.constant 0 : i32
    %c0_i32_0 = arith.constant 0 : i32
    %c0_i32_1 = arith.constant 0 : i32
    return %c0_i32, %c0_i32_0 : i32, i32
  }
  func.func @transform_2(%arg0: i32) -> (i32, i32) {
    %c0_i32 = arith.constant 0 : i32
    %c0_i32_0 = arith.constant 0 : i32
    %c0_i32_1 = arith.constant 0 : i32
    return %c0_i32, %c0_i32_0 : i32, i32
  }
  func.func @transform_3(%arg0: i32) -> (i32, i32) {
    %c0_i32 = arith.constant 0 : i32
    %c0_i32_0 = arith.constant 0 : i32
    %c0_i32_1 = arith.constant 0 : i32
    return %c0_i32, %c0_i32_0 : i32, i32
  }
  func.func @transform_4(%arg0: i32) -> (i32, i32, i32) {
    %c0_i32 = arith.constant 0 : i32
    %c0_i32_0 = arith.constant 0 : i32
    %c0_i32_1 = arith.constant 0 : i32
    return %arg0, %c0_i32, %c0_i32_0 : i32, i32, i32
  }
}

module attributes {stable_mosaic.version = 11 : i64} {
  func.func @_tail_kernel(%arg0: i32, %arg1: memref<1x8x32xf32, #tpu.memory_space<vmem>>, %arg2: memref<1x32xf32, #tpu.memory_space<vmem>>, %arg3: memref<1x32xf32, #tpu.memory_space<vmem>>, %arg4: memref<32x16xf32, #tpu.memory_space<vmem>>, %arg5: memref<1x16xf32, #tpu.memory_space<vmem>>, %arg6: memref<16x1xf32, #tpu.memory_space<vmem>>, %arg7: memref<1x1xf32, #tpu.memory_space<vmem>>, %arg8: memref<3x96x32xf32, #tpu.memory_space<vmem>>, %arg9: memref<3x1x32xf32, #tpu.memory_space<vmem>>, %arg10: memref<3x32x16xf32, #tpu.memory_space<vmem>>, %arg11: memref<3x1x16xf32, #tpu.memory_space<vmem>>, %arg12: memref<3x16x1xf32, #tpu.memory_space<vmem>>, %arg13: memref<3x1x1xf32, #tpu.memory_space<vmem>>, %arg14: memref<96x32xf32, #tpu.memory_space<vmem>>, %arg15: memref<1x32xf32, #tpu.memory_space<vmem>>, %arg16: memref<32x16xf32, #tpu.memory_space<vmem>>, %arg17: memref<1x16xf32, #tpu.memory_space<vmem>>, %arg18: memref<16x8xf32, #tpu.memory_space<vmem>>, %arg19: memref<1x8xf32, #tpu.memory_space<vmem>>, %arg20: memref<8x1xf32, #tpu.memory_space<vmem>>, %arg21: memref<1x1xf32, #tpu.memory_space<vmem>>, %arg22: memref<1x1x8xf32, #tpu.memory_space<vmem>>) attributes {dimension_semantics = [#tpu.dimension_semantics<parallel>], iteration_bounds = array<i64: 2>, scalar_prefetch = 0 : i64, scratch_operands = 0 : i64, tpu.core_type = #tpu.core_type<tc>, window_params = [{transform_indices = @transform_0, window_bounds = array<i64: 1, 8, 32>}, {pipeline_mode = #tpu.pipeline_mode<synchronous>, transform_indices = @transform_1, window_bounds = array<i64: 1, 32>}, {pipeline_mode = #tpu.pipeline_mode<synchronous>, transform_indices = @transform_2, window_bounds = array<i64: 1, 32>}, {pipeline_mode = #tpu.pipeline_mode<synchronous>, transform_indices = @transform_3, window_bounds = array<i64: 32, 16>}, {pipeline_mode = #tpu.pipeline_mode<synchronous>, transform_indices = @transform_4, window_bounds = array<i64: 1, 16>}, {pipeline_mode = #tpu.pipeline_mode<synchronous>, transform_indices = @transform_5, window_bounds = array<i64: 16, 1>}, {pipeline_mode = #tpu.pipeline_mode<synchronous>, transform_indices = @transform_6, window_bounds = array<i64: 1, 1>}, {pipeline_mode = #tpu.pipeline_mode<synchronous>, transform_indices = @transform_7, window_bounds = array<i64: 3, 96, 32>}, {pipeline_mode = #tpu.pipeline_mode<synchronous>, transform_indices = @transform_8, window_bounds = array<i64: 3, 1, 32>}, {pipeline_mode = #tpu.pipeline_mode<synchronous>, transform_indices = @transform_9, window_bounds = array<i64: 3, 32, 16>}, {pipeline_mode = #tpu.pipeline_mode<synchronous>, transform_indices = @transform_10, window_bounds = array<i64: 3, 1, 16>}, {pipeline_mode = #tpu.pipeline_mode<synchronous>, transform_indices = @transform_11, window_bounds = array<i64: 3, 16, 1>}, {pipeline_mode = #tpu.pipeline_mode<synchronous>, transform_indices = @transform_12, window_bounds = array<i64: 3, 1, 1>}, {pipeline_mode = #tpu.pipeline_mode<synchronous>, transform_indices = @transform_13, window_bounds = array<i64: 96, 32>}, {pipeline_mode = #tpu.pipeline_mode<synchronous>, transform_indices = @transform_14, window_bounds = array<i64: 1, 32>}, {pipeline_mode = #tpu.pipeline_mode<synchronous>, transform_indices = @transform_15, window_bounds = array<i64: 32, 16>}, {pipeline_mode = #tpu.pipeline_mode<synchronous>, transform_indices = @transform_16, window_bounds = array<i64: 1, 16>}, {pipeline_mode = #tpu.pipeline_mode<synchronous>, transform_indices = @transform_17, window_bounds = array<i64: 16, 8>}, {pipeline_mode = #tpu.pipeline_mode<synchronous>, transform_indices = @transform_18, window_bounds = array<i64: 1, 8>}, {pipeline_mode = #tpu.pipeline_mode<synchronous>, transform_indices = @transform_19, window_bounds = array<i64: 8, 1>}, {pipeline_mode = #tpu.pipeline_mode<synchronous>, transform_indices = @transform_20, window_bounds = array<i64: 1, 1>}, {transform_indices = @transform_21, window_bounds = array<i64: 1, 1, 8>}]} {
    %c0 = arith.constant 0 : index
    %c0_0 = arith.constant 0 : index
    %c0_1 = arith.constant 0 : index
    %0 = vector.load %arg1[%c0, %c0_0, %c0_1] : memref<1x8x32xf32, #tpu.memory_space<vmem>>, vector<1x8x32xf32>
    %1 = vector.shape_cast %0 : vector<1x8x32xf32> to vector<8x32xf32>
    %c0_2 = arith.constant 0 : index
    %c0_3 = arith.constant 0 : index
    %2 = vector.load %arg2[%c0_2, %c0_3] : memref<1x32xf32, #tpu.memory_space<vmem>>, vector<1x32xf32>
    %c0_4 = arith.constant 0 : index
    %c0_5 = arith.constant 0 : index
    %3 = vector.load %arg3[%c0_4, %c0_5] : memref<1x32xf32, #tpu.memory_space<vmem>>, vector<1x32xf32>
    %cst = arith.constant dense<0.000000e+00> : vector<8xf32>
    %4 = vector.multi_reduction <add>, %1, %cst [1] : vector<8x32xf32> to vector<8xf32>
    %5 = vector.shape_cast %4 : vector<8xf32> to vector<8x1xf32>
    %cst_6 = arith.constant 3.200000e+01 : f32
    %6 = vector.broadcast %cst_6 : f32 to vector<8x1xf32>
    %7 = arith.divf %5, %6 : vector<8x1xf32>
    %8 = vector.broadcast %7 : vector<8x1xf32> to vector<8x32xf32>
    %9 = arith.subf %1, %8 : vector<8x32xf32>
    %10 = arith.mulf %9, %9 : vector<8x32xf32>
    %cst_7 = arith.constant dense<0.000000e+00> : vector<8xf32>
    %11 = vector.multi_reduction <add>, %10, %cst_7 [1] : vector<8x32xf32> to vector<8xf32>
    %12 = vector.shape_cast %11 : vector<8xf32> to vector<8x1xf32>
    %cst_8 = arith.constant 3.200000e+01 : f32
    %13 = vector.broadcast %cst_8 : f32 to vector<8x1xf32>
    %14 = arith.divf %12, %13 : vector<8x1xf32>
    %15 = vector.broadcast %7 : vector<8x1xf32> to vector<8x32xf32>
    %16 = arith.subf %1, %15 : vector<8x32xf32>
    %cst_9 = arith.constant 9.99999974E-6 : f32
    %17 = vector.broadcast %cst_9 : f32 to vector<8x1xf32>
    %18 = arith.addf %14, %17 : vector<8x1xf32>
    %19 = math.rsqrt %18 : vector<8x1xf32>
    %20 = vector.broadcast %19 : vector<8x1xf32> to vector<8x32xf32>
    %21 = arith.mulf %16, %20 : vector<8x32xf32>
    %22 = vector.broadcast %2 : vector<1x32xf32> to vector<8x32xf32>
    %23 = arith.mulf %21, %22 : vector<8x32xf32>
    %24 = vector.broadcast %3 : vector<1x32xf32> to vector<8x32xf32>
    %25 = arith.addf %23, %24 : vector<8x32xf32>
    %26 = vector.extract_strided_slice %25 {offsets = [7, 0], sizes = [1, 32], strides = [1, 1]} : vector<8x32xf32> to vector<1x32xf32>
    %cst_10 = arith.constant dense<0.000000e+00> : vector<32xf32>
    %27 = vector.multi_reduction <add>, %25, %cst_10 [0] : vector<8x32xf32> to vector<32xf32>
    %28 = vector.shape_cast %27 : vector<32xf32> to vector<1x32xf32>
    %cst_11 = arith.constant 8.000000e+00 : f32
    %29 = vector.broadcast %cst_11 : f32 to vector<1x32xf32>
    %30 = arith.divf %28, %29 : vector<1x32xf32>
    %c0_12 = arith.constant 0 : index
    %c0_13 = arith.constant 0 : index
    %31 = vector.load %arg4[%c0_12, %c0_13] : memref<32x16xf32, #tpu.memory_space<vmem>>, vector<32x16xf32>
    %cst_14 = arith.constant dense<0.000000e+00> : vector<8x16xf32>
    %32 = tpu.matmul %25, %31, %cst_14 {dimension_numbers = #tpu.dot_dimension_numbers<[1], [0], [0], [1], [0, 0, 1, 1], [], []>} : vector<8x32xf32>, vector<32x16xf32>, vector<8x16xf32> -> vector<8x16xf32>
    %c0_15 = arith.constant 0 : index
    %c0_16 = arith.constant 0 : index
    %33 = vector.load %arg5[%c0_15, %c0_16] : memref<1x16xf32, #tpu.memory_space<vmem>>, vector<1x16xf32>
    %34 = vector.broadcast %33 : vector<1x16xf32> to vector<8x16xf32>
    %35 = arith.addf %32, %34 : vector<8x16xf32>
    %cst_17 = arith.constant 0.000000e+00 : f32
    %36 = vector.broadcast %cst_17 : f32 to vector<8x16xf32>
    %37 = arith.maximumf %35, %36 : vector<8x16xf32>
    %c0_18 = arith.constant 0 : index
    %c0_19 = arith.constant 0 : index
    %38 = vector.load %arg6[%c0_18, %c0_19] : memref<16x1xf32, #tpu.memory_space<vmem>>, vector<16x1xf32>
    %cst_20 = arith.constant dense<0.000000e+00> : vector<8x1xf32>
    %39 = tpu.matmul %37, %38, %cst_20 {dimension_numbers = #tpu.dot_dimension_numbers<[1], [0], [0], [1], [0, 0, 1, 1], [], []>} : vector<8x16xf32>, vector<16x1xf32>, vector<8x1xf32> -> vector<8x1xf32>
    %c0_21 = arith.constant 0 : index
    %c0_22 = arith.constant 0 : index
    %40 = vector.load %arg7[%c0_21, %c0_22] : memref<1x1xf32, #tpu.memory_space<vmem>>, vector<1x1xf32>
    %41 = vector.broadcast %40 : vector<1x1xf32> to vector<8x1xf32>
    %42 = arith.addf %39, %41 : vector<8x1xf32>
    %cst_23 = arith.constant dense<0xFF800000> : vector<1xf32>
    %43 = vector.multi_reduction <maximumf>, %42, %cst_23 [0] : vector<8x1xf32> to vector<1xf32>
    %44 = vector.shape_cast %43 : vector<1xf32> to vector<1x1xf32>
    %45 = vector.broadcast %44 : vector<1x1xf32> to vector<8x1xf32>
    %46 = arith.subf %42, %45 : vector<8x1xf32>
    %47 = math.exp %46 : vector<8x1xf32>
    %cst_24 = arith.constant dense<0.000000e+00> : vector<1xf32>
    %48 = vector.multi_reduction <add>, %47, %cst_24 [0] : vector<8x1xf32> to vector<1xf32>
    %49 = vector.shape_cast %48 : vector<1xf32> to vector<1x1xf32>
    %50 = vector.broadcast %49 : vector<1x1xf32> to vector<8x1xf32>
    %51 = arith.divf %47, %50 : vector<8x1xf32>
    %52 = vector.broadcast %51 : vector<8x1xf32> to vector<8x32xf32>
    %53 = arith.mulf %25, %52 : vector<8x32xf32>
    %cst_25 = arith.constant dense<0.000000e+00> : vector<32xf32>
    %54 = vector.multi_reduction <add>, %53, %cst_25 [0] : vector<8x32xf32> to vector<32xf32>
    %55 = vector.shape_cast %54 : vector<32xf32> to vector<1x32xf32>
    %c0_26 = arith.constant 0 : index
    %c0_27 = arith.constant 0 : index
    %c0_28 = arith.constant 0 : index
    %56 = vector.load %arg8[%c0_26, %c0_27, %c0_28] : memref<3x96x32xf32, #tpu.memory_space<vmem>>, vector<1x96x32xf32>
    %57 = vector.shape_cast %56 : vector<1x96x32xf32> to vector<96x32xf32>
    %c0_29 = arith.constant 0 : index
    %c0_30 = arith.constant 0 : index
    %c0_31 = arith.constant 0 : index
    %58 = vector.load %arg9[%c0_29, %c0_30, %c0_31] : memref<3x1x32xf32, #tpu.memory_space<vmem>>, vector<1x1x32xf32>
    %59 = vector.shape_cast %58 : vector<1x1x32xf32> to vector<1x32xf32>
    %60 = vector.extract_strided_slice %57 {offsets = [0, 0], sizes = [32, 32], strides = [1, 1]} : vector<96x32xf32> to vector<32x32xf32>
    %cst_32 = arith.constant dense<0.000000e+00> : vector<1x32xf32>
    %61 = tpu.matmul %26, %60, %cst_32 {dimension_numbers = #tpu.dot_dimension_numbers<[1], [0], [0], [1], [0, 0, 1, 1], [], []>} : vector<1x32xf32>, vector<32x32xf32>, vector<1x32xf32> -> vector<1x32xf32>
    %62 = vector.extract_strided_slice %57 {offsets = [32, 0], sizes = [32, 32], strides = [1, 1]} : vector<96x32xf32> to vector<32x32xf32>
    %cst_33 = arith.constant dense<0.000000e+00> : vector<1x32xf32>
    %63 = tpu.matmul %30, %62, %cst_33 {dimension_numbers = #tpu.dot_dimension_numbers<[1], [0], [0], [1], [0, 0, 1, 1], [], []>} : vector<1x32xf32>, vector<32x32xf32>, vector<1x32xf32> -> vector<1x32xf32>
    %64 = arith.addf %61, %63 : vector<1x32xf32>
    %65 = vector.extract_strided_slice %57 {offsets = [64, 0], sizes = [32, 32], strides = [1, 1]} : vector<96x32xf32> to vector<32x32xf32>
    %cst_34 = arith.constant dense<0.000000e+00> : vector<1x32xf32>
    %66 = tpu.matmul %55, %65, %cst_34 {dimension_numbers = #tpu.dot_dimension_numbers<[1], [0], [0], [1], [0, 0, 1, 1], [], []>} : vector<1x32xf32>, vector<32x32xf32>, vector<1x32xf32> -> vector<1x32xf32>
    %67 = arith.addf %64, %66 : vector<1x32xf32>
    %68 = arith.addf %67, %59 : vector<1x32xf32>
    %cst_35 = arith.constant 0.000000e+00 : f32
    %69 = vector.broadcast %cst_35 : f32 to vector<1x32xf32>
    %70 = arith.maximumf %68, %69 : vector<1x32xf32>
    %c0_36 = arith.constant 0 : index
    %c0_37 = arith.constant 0 : index
    %c0_38 = arith.constant 0 : index
    %71 = vector.load %arg10[%c0_36, %c0_37, %c0_38] : memref<3x32x16xf32, #tpu.memory_space<vmem>>, vector<1x32x16xf32>
    %72 = vector.shape_cast %71 : vector<1x32x16xf32> to vector<32x16xf32>
    %cst_39 = arith.constant dense<0.000000e+00> : vector<1x16xf32>
    %73 = tpu.matmul %70, %72, %cst_39 {dimension_numbers = #tpu.dot_dimension_numbers<[1], [0], [0], [1], [0, 0, 1, 1], [], []>} : vector<1x32xf32>, vector<32x16xf32>, vector<1x16xf32> -> vector<1x16xf32>
    %c0_40 = arith.constant 0 : index
    %c0_41 = arith.constant 0 : index
    %c0_42 = arith.constant 0 : index
    %74 = vector.load %arg11[%c0_40, %c0_41, %c0_42] : memref<3x1x16xf32, #tpu.memory_space<vmem>>, vector<1x1x16xf32>
    %75 = vector.shape_cast %74 : vector<1x1x16xf32> to vector<1x16xf32>
    %76 = arith.addf %73, %75 : vector<1x16xf32>
    %cst_43 = arith.constant 0.000000e+00 : f32
    %77 = vector.broadcast %cst_43 : f32 to vector<1x16xf32>
    %78 = arith.maximumf %76, %77 : vector<1x16xf32>
    %c0_44 = arith.constant 0 : index
    %c0_45 = arith.constant 0 : index
    %c0_46 = arith.constant 0 : index
    %79 = vector.load %arg12[%c0_44, %c0_45, %c0_46] : memref<3x16x1xf32, #tpu.memory_space<vmem>>, vector<1x16x1xf32>
    %80 = vector.shape_cast %79 : vector<1x16x1xf32> to vector<16x1xf32>
    %cst_47 = arith.constant dense<0.000000e+00> : vector<1x1xf32>
    %81 = tpu.matmul %78, %80, %cst_47 {dimension_numbers = #tpu.dot_dimension_numbers<[1], [0], [0], [1], [0, 0, 1, 1], [], []>} : vector<1x16xf32>, vector<16x1xf32>, vector<1x1xf32> -> vector<1x1xf32>
    %c0_48 = arith.constant 0 : index
    %c0_49 = arith.constant 0 : index
    %c0_50 = arith.constant 0 : index
    %82 = vector.load %arg13[%c0_48, %c0_49, %c0_50] : memref<3x1x1xf32, #tpu.memory_space<vmem>>, vector<1x1x1xf32>
    %83 = vector.shape_cast %82 : vector<1x1x1xf32> to vector<1x1xf32>
    %84 = arith.addf %81, %83 : vector<1x1xf32>
    %c1 = arith.constant 1 : index
    %c0_51 = arith.constant 0 : index
    %c0_52 = arith.constant 0 : index
    %85 = vector.load %arg8[%c1, %c0_51, %c0_52] : memref<3x96x32xf32, #tpu.memory_space<vmem>>, vector<1x96x32xf32>
    %86 = vector.shape_cast %85 : vector<1x96x32xf32> to vector<96x32xf32>
    %c1_53 = arith.constant 1 : index
    %c0_54 = arith.constant 0 : index
    %c0_55 = arith.constant 0 : index
    %87 = vector.load %arg9[%c1_53, %c0_54, %c0_55] : memref<3x1x32xf32, #tpu.memory_space<vmem>>, vector<1x1x32xf32>
    %88 = vector.shape_cast %87 : vector<1x1x32xf32> to vector<1x32xf32>
    %89 = vector.extract_strided_slice %86 {offsets = [0, 0], sizes = [32, 32], strides = [1, 1]} : vector<96x32xf32> to vector<32x32xf32>
    %cst_56 = arith.constant dense<0.000000e+00> : vector<1x32xf32>
    %90 = tpu.matmul %26, %89, %cst_56 {dimension_numbers = #tpu.dot_dimension_numbers<[1], [0], [0], [1], [0, 0, 1, 1], [], []>} : vector<1x32xf32>, vector<32x32xf32>, vector<1x32xf32> -> vector<1x32xf32>
    %91 = vector.extract_strided_slice %86 {offsets = [32, 0], sizes = [32, 32], strides = [1, 1]} : vector<96x32xf32> to vector<32x32xf32>
    %cst_57 = arith.constant dense<0.000000e+00> : vector<1x32xf32>
    %92 = tpu.matmul %30, %91, %cst_57 {dimension_numbers = #tpu.dot_dimension_numbers<[1], [0], [0], [1], [0, 0, 1, 1], [], []>} : vector<1x32xf32>, vector<32x32xf32>, vector<1x32xf32> -> vector<1x32xf32>
    %93 = arith.addf %90, %92 : vector<1x32xf32>
    %94 = vector.extract_strided_slice %86 {offsets = [64, 0], sizes = [32, 32], strides = [1, 1]} : vector<96x32xf32> to vector<32x32xf32>
    %cst_58 = arith.constant dense<0.000000e+00> : vector<1x32xf32>
    %95 = tpu.matmul %55, %94, %cst_58 {dimension_numbers = #tpu.dot_dimension_numbers<[1], [0], [0], [1], [0, 0, 1, 1], [], []>} : vector<1x32xf32>, vector<32x32xf32>, vector<1x32xf32> -> vector<1x32xf32>
    %96 = arith.addf %93, %95 : vector<1x32xf32>
    %97 = arith.addf %96, %88 : vector<1x32xf32>
    %cst_59 = arith.constant 0.000000e+00 : f32
    %98 = vector.broadcast %cst_59 : f32 to vector<1x32xf32>
    %99 = arith.maximumf %97, %98 : vector<1x32xf32>
    %c1_60 = arith.constant 1 : index
    %c0_61 = arith.constant 0 : index
    %c0_62 = arith.constant 0 : index
    %100 = vector.load %arg10[%c1_60, %c0_61, %c0_62] : memref<3x32x16xf32, #tpu.memory_space<vmem>>, vector<1x32x16xf32>
    %101 = vector.shape_cast %100 : vector<1x32x16xf32> to vector<32x16xf32>
    %cst_63 = arith.constant dense<0.000000e+00> : vector<1x16xf32>
    %102 = tpu.matmul %99, %101, %cst_63 {dimension_numbers = #tpu.dot_dimension_numbers<[1], [0], [0], [1], [0, 0, 1, 1], [], []>} : vector<1x32xf32>, vector<32x16xf32>, vector<1x16xf32> -> vector<1x16xf32>
    %c1_64 = arith.constant 1 : index
    %c0_65 = arith.constant 0 : index
    %c0_66 = arith.constant 0 : index
    %103 = vector.load %arg11[%c1_64, %c0_65, %c0_66] : memref<3x1x16xf32, #tpu.memory_space<vmem>>, vector<1x1x16xf32>
    %104 = vector.shape_cast %103 : vector<1x1x16xf32> to vector<1x16xf32>
    %105 = arith.addf %102, %104 : vector<1x16xf32>
    %cst_67 = arith.constant 0.000000e+00 : f32
    %106 = vector.broadcast %cst_67 : f32 to vector<1x16xf32>
    %107 = arith.maximumf %105, %106 : vector<1x16xf32>
    %c1_68 = arith.constant 1 : index
    %c0_69 = arith.constant 0 : index
    %c0_70 = arith.constant 0 : index
    %108 = vector.load %arg12[%c1_68, %c0_69, %c0_70] : memref<3x16x1xf32, #tpu.memory_space<vmem>>, vector<1x16x1xf32>
    %109 = vector.shape_cast %108 : vector<1x16x1xf32> to vector<16x1xf32>
    %cst_71 = arith.constant dense<0.000000e+00> : vector<1x1xf32>
    %110 = tpu.matmul %107, %109, %cst_71 {dimension_numbers = #tpu.dot_dimension_numbers<[1], [0], [0], [1], [0, 0, 1, 1], [], []>} : vector<1x16xf32>, vector<16x1xf32>, vector<1x1xf32> -> vector<1x1xf32>
    %c1_72 = arith.constant 1 : index
    %c0_73 = arith.constant 0 : index
    %c0_74 = arith.constant 0 : index
    %111 = vector.load %arg13[%c1_72, %c0_73, %c0_74] : memref<3x1x1xf32, #tpu.memory_space<vmem>>, vector<1x1x1xf32>
    %112 = vector.shape_cast %111 : vector<1x1x1xf32> to vector<1x1xf32>
    %113 = arith.addf %110, %112 : vector<1x1xf32>
    %c2 = arith.constant 2 : index
    %c0_75 = arith.constant 0 : index
    %c0_76 = arith.constant 0 : index
    %114 = vector.load %arg8[%c2, %c0_75, %c0_76] : memref<3x96x32xf32, #tpu.memory_space<vmem>>, vector<1x96x32xf32>
    %115 = vector.shape_cast %114 : vector<1x96x32xf32> to vector<96x32xf32>
    %c2_77 = arith.constant 2 : index
    %c0_78 = arith.constant 0 : index
    %c0_79 = arith.constant 0 : index
    %116 = vector.load %arg9[%c2_77, %c0_78, %c0_79] : memref<3x1x32xf32, #tpu.memory_space<vmem>>, vector<1x1x32xf32>
    %117 = vector.shape_cast %116 : vector<1x1x32xf32> to vector<1x32xf32>
    %118 = vector.extract_strided_slice %115 {offsets = [0, 0], sizes = [32, 32], strides = [1, 1]} : vector<96x32xf32> to vector<32x32xf32>
    %cst_80 = arith.constant dense<0.000000e+00> : vector<1x32xf32>
    %119 = tpu.matmul %26, %118, %cst_80 {dimension_numbers = #tpu.dot_dimension_numbers<[1], [0], [0], [1], [0, 0, 1, 1], [], []>} : vector<1x32xf32>, vector<32x32xf32>, vector<1x32xf32> -> vector<1x32xf32>
    %120 = vector.extract_strided_slice %115 {offsets = [32, 0], sizes = [32, 32], strides = [1, 1]} : vector<96x32xf32> to vector<32x32xf32>
    %cst_81 = arith.constant dense<0.000000e+00> : vector<1x32xf32>
    %121 = tpu.matmul %30, %120, %cst_81 {dimension_numbers = #tpu.dot_dimension_numbers<[1], [0], [0], [1], [0, 0, 1, 1], [], []>} : vector<1x32xf32>, vector<32x32xf32>, vector<1x32xf32> -> vector<1x32xf32>
    %122 = arith.addf %119, %121 : vector<1x32xf32>
    %123 = vector.extract_strided_slice %115 {offsets = [64, 0], sizes = [32, 32], strides = [1, 1]} : vector<96x32xf32> to vector<32x32xf32>
    %cst_82 = arith.constant dense<0.000000e+00> : vector<1x32xf32>
    %124 = tpu.matmul %55, %123, %cst_82 {dimension_numbers = #tpu.dot_dimension_numbers<[1], [0], [0], [1], [0, 0, 1, 1], [], []>} : vector<1x32xf32>, vector<32x32xf32>, vector<1x32xf32> -> vector<1x32xf32>
    %125 = arith.addf %122, %124 : vector<1x32xf32>
    %126 = arith.addf %125, %117 : vector<1x32xf32>
    %cst_83 = arith.constant 0.000000e+00 : f32
    %127 = vector.broadcast %cst_83 : f32 to vector<1x32xf32>
    %128 = arith.maximumf %126, %127 : vector<1x32xf32>
    %c2_84 = arith.constant 2 : index
    %c0_85 = arith.constant 0 : index
    %c0_86 = arith.constant 0 : index
    %129 = vector.load %arg10[%c2_84, %c0_85, %c0_86] : memref<3x32x16xf32, #tpu.memory_space<vmem>>, vector<1x32x16xf32>
    %130 = vector.shape_cast %129 : vector<1x32x16xf32> to vector<32x16xf32>
    %cst_87 = arith.constant dense<0.000000e+00> : vector<1x16xf32>
    %131 = tpu.matmul %128, %130, %cst_87 {dimension_numbers = #tpu.dot_dimension_numbers<[1], [0], [0], [1], [0, 0, 1, 1], [], []>} : vector<1x32xf32>, vector<32x16xf32>, vector<1x16xf32> -> vector<1x16xf32>
    %c2_88 = arith.constant 2 : index
    %c0_89 = arith.constant 0 : index
    %c0_90 = arith.constant 0 : index
    %132 = vector.load %arg11[%c2_88, %c0_89, %c0_90] : memref<3x1x16xf32, #tpu.memory_space<vmem>>, vector<1x1x16xf32>
    %133 = vector.shape_cast %132 : vector<1x1x16xf32> to vector<1x16xf32>
    %134 = arith.addf %131, %133 : vector<1x16xf32>
    %cst_91 = arith.constant 0.000000e+00 : f32
    %135 = vector.broadcast %cst_91 : f32 to vector<1x16xf32>
    %136 = arith.maximumf %134, %135 : vector<1x16xf32>
    %c2_92 = arith.constant 2 : index
    %c0_93 = arith.constant 0 : index
    %c0_94 = arith.constant 0 : index
    %137 = vector.load %arg12[%c2_92, %c0_93, %c0_94] : memref<3x16x1xf32, #tpu.memory_space<vmem>>, vector<1x16x1xf32>
    %138 = vector.shape_cast %137 : vector<1x16x1xf32> to vector<16x1xf32>
    %cst_95 = arith.constant dense<0.000000e+00> : vector<1x1xf32>
    %139 = tpu.matmul %136, %138, %cst_95 {dimension_numbers = #tpu.dot_dimension_numbers<[1], [0], [0], [1], [0, 0, 1, 1], [], []>} : vector<1x16xf32>, vector<16x1xf32>, vector<1x1xf32> -> vector<1x1xf32>
    %c2_96 = arith.constant 2 : index
    %c0_97 = arith.constant 0 : index
    %c0_98 = arith.constant 0 : index
    %140 = vector.load %arg13[%c2_96, %c0_97, %c0_98] : memref<3x1x1xf32, #tpu.memory_space<vmem>>, vector<1x1x1xf32>
    %141 = vector.shape_cast %140 : vector<1x1x1xf32> to vector<1x1xf32>
    %142 = arith.addf %139, %141 : vector<1x1xf32>
    %c0_99 = arith.constant 0 : index
    %c0_100 = arith.constant 0 : index
    %143 = vector.load %arg14[%c0_99, %c0_100] : memref<96x32xf32, #tpu.memory_space<vmem>>, vector<96x32xf32>
    %c0_101 = arith.constant 0 : index
    %c0_102 = arith.constant 0 : index
    %144 = vector.load %arg15[%c0_101, %c0_102] : memref<1x32xf32, #tpu.memory_space<vmem>>, vector<1x32xf32>
    %145 = vector.extract_strided_slice %143 {offsets = [0, 0], sizes = [32, 32], strides = [1, 1]} : vector<96x32xf32> to vector<32x32xf32>
    %cst_103 = arith.constant dense<0.000000e+00> : vector<1x32xf32>
    %146 = tpu.matmul %26, %145, %cst_103 {dimension_numbers = #tpu.dot_dimension_numbers<[1], [0], [0], [1], [0, 0, 1, 1], [], []>} : vector<1x32xf32>, vector<32x32xf32>, vector<1x32xf32> -> vector<1x32xf32>
    %147 = vector.extract_strided_slice %143 {offsets = [32, 0], sizes = [32, 32], strides = [1, 1]} : vector<96x32xf32> to vector<32x32xf32>
    %cst_104 = arith.constant dense<0.000000e+00> : vector<1x32xf32>
    %148 = tpu.matmul %30, %147, %cst_104 {dimension_numbers = #tpu.dot_dimension_numbers<[1], [0], [0], [1], [0, 0, 1, 1], [], []>} : vector<1x32xf32>, vector<32x32xf32>, vector<1x32xf32> -> vector<1x32xf32>
    %149 = arith.addf %146, %148 : vector<1x32xf32>
    %150 = vector.extract_strided_slice %143 {offsets = [64, 0], sizes = [32, 32], strides = [1, 1]} : vector<96x32xf32> to vector<32x32xf32>
    %cst_105 = arith.constant dense<0.000000e+00> : vector<1x32xf32>
    %151 = tpu.matmul %55, %150, %cst_105 {dimension_numbers = #tpu.dot_dimension_numbers<[1], [0], [0], [1], [0, 0, 1, 1], [], []>} : vector<1x32xf32>, vector<32x32xf32>, vector<1x32xf32> -> vector<1x32xf32>
    %152 = arith.addf %149, %151 : vector<1x32xf32>
    %153 = arith.addf %152, %144 : vector<1x32xf32>
    %cst_106 = arith.constant 0.000000e+00 : f32
    %154 = vector.broadcast %cst_106 : f32 to vector<1x32xf32>
    %155 = arith.cmpf ogt, %153, %154 : vector<1x32xf32>
    %cst_107 = arith.constant 1.000000e-01 : f32
    %156 = vector.broadcast %cst_107 : f32 to vector<1x32xf32>
    %157 = arith.mulf %156, %153 : vector<1x32xf32>
    %158 = arith.select %155, %153, %157 : vector<1x32xi1>, vector<1x32xf32>
    %c0_108 = arith.constant 0 : index
    %c0_109 = arith.constant 0 : index
    %159 = vector.load %arg16[%c0_108, %c0_109] : memref<32x16xf32, #tpu.memory_space<vmem>>, vector<32x16xf32>
    %cst_110 = arith.constant dense<0.000000e+00> : vector<1x16xf32>
    %160 = tpu.matmul %158, %159, %cst_110 {dimension_numbers = #tpu.dot_dimension_numbers<[1], [0], [0], [1], [0, 0, 1, 1], [], []>} : vector<1x32xf32>, vector<32x16xf32>, vector<1x16xf32> -> vector<1x16xf32>
    %c0_111 = arith.constant 0 : index
    %c0_112 = arith.constant 0 : index
    %161 = vector.load %arg17[%c0_111, %c0_112] : memref<1x16xf32, #tpu.memory_space<vmem>>, vector<1x16xf32>
    %162 = arith.addf %160, %161 : vector<1x16xf32>
    %cst_113 = arith.constant 0.000000e+00 : f32
    %163 = vector.broadcast %cst_113 : f32 to vector<1x16xf32>
    %164 = arith.cmpf ogt, %162, %163 : vector<1x16xf32>
    %cst_114 = arith.constant 1.000000e-01 : f32
    %165 = vector.broadcast %cst_114 : f32 to vector<1x16xf32>
    %166 = arith.mulf %165, %162 : vector<1x16xf32>
    %167 = arith.select %164, %162, %166 : vector<1x16xi1>, vector<1x16xf32>
    %c0_115 = arith.constant 0 : index
    %c0_116 = arith.constant 0 : index
    %168 = vector.load %arg18[%c0_115, %c0_116] : memref<16x8xf32, #tpu.memory_space<vmem>>, vector<16x8xf32>
    %cst_117 = arith.constant dense<0.000000e+00> : vector<1x8xf32>
    %169 = tpu.matmul %167, %168, %cst_117 {dimension_numbers = #tpu.dot_dimension_numbers<[1], [0], [0], [1], [0, 0, 1, 1], [], []>} : vector<1x16xf32>, vector<16x8xf32>, vector<1x8xf32> -> vector<1x8xf32>
    %c0_118 = arith.constant 0 : index
    %c0_119 = arith.constant 0 : index
    %170 = vector.load %arg19[%c0_118, %c0_119] : memref<1x8xf32, #tpu.memory_space<vmem>>, vector<1x8xf32>
    %171 = arith.addf %169, %170 : vector<1x8xf32>
    %cst_120 = arith.constant 0.000000e+00 : f32
    %172 = vector.broadcast %cst_120 : f32 to vector<1x8xf32>
    %173 = arith.cmpf ogt, %171, %172 : vector<1x8xf32>
    %cst_121 = arith.constant 1.000000e-01 : f32
    %174 = vector.broadcast %cst_121 : f32 to vector<1x8xf32>
    %175 = arith.mulf %174, %171 : vector<1x8xf32>
    %176 = arith.select %173, %171, %175 : vector<1x8xi1>, vector<1x8xf32>
    %c0_122 = arith.constant 0 : index
    %c0_123 = arith.constant 0 : index
    %177 = vector.load %arg20[%c0_122, %c0_123] : memref<8x1xf32, #tpu.memory_space<vmem>>, vector<8x1xf32>
    %cst_124 = arith.constant dense<0.000000e+00> : vector<1x1xf32>
    %178 = tpu.matmul %176, %177, %cst_124 {dimension_numbers = #tpu.dot_dimension_numbers<[1], [0], [0], [1], [0, 0, 1, 1], [], []>} : vector<1x8xf32>, vector<8x1xf32>, vector<1x1xf32> -> vector<1x1xf32>
    %c0_125 = arith.constant 0 : index
    %c0_126 = arith.constant 0 : index
    %179 = vector.load %arg21[%c0_125, %c0_126] : memref<1x1xf32, #tpu.memory_space<vmem>>, vector<1x1xf32>
    %180 = arith.addf %178, %179 : vector<1x1xf32>
    %cst_127 = arith.constant 0.000000e+00 : f32
    %181 = vector.broadcast %cst_127 : f32 to vector<1x1xf32>
    %182 = arith.subf %181, %180 : vector<1x1xf32>
    %183 = math.exp %182 : vector<1x1xf32>
    %cst_128 = arith.constant 1.000000e+00 : f32
    %184 = vector.broadcast %cst_128 : f32 to vector<1x1xf32>
    %185 = arith.addf %184, %183 : vector<1x1xf32>
    %cst_129 = arith.constant 1.000000e+00 : f32
    %186 = vector.broadcast %cst_129 : f32 to vector<1x1xf32>
    %187 = arith.divf %186, %185 : vector<1x1xf32>
    %188 = tpu.iota {dimensions = array<i32: 1>} : vector<1x8xi32>
    %c0_i32 = arith.constant 0 : i32
    %189 = vector.broadcast %c0_i32 : i32 to vector<1x8xi32>
    %190 = arith.cmpi eq, %188, %189 : vector<1x8xi32>
    %cst_130 = arith.constant 0.000000e+00 : f32
    %191 = vector.shape_cast %180 : vector<1x1xf32> to vector<1x1xf32>
    %192 = vector.broadcast %191 : vector<1x1xf32> to vector<1x8xf32>
    %193 = vector.broadcast %cst_130 : f32 to vector<1x8xf32>
    %194 = arith.select %190, %192, %193 : vector<1x8xi1>, vector<1x8xf32>
    %c1_i32 = arith.constant 1 : i32
    %195 = vector.broadcast %c1_i32 : i32 to vector<1x8xi32>
    %196 = arith.cmpi eq, %188, %195 : vector<1x8xi32>
    %cst_131 = arith.constant 0.000000e+00 : f32
    %197 = vector.shape_cast %187 : vector<1x1xf32> to vector<1x1xf32>
    %198 = vector.broadcast %197 : vector<1x1xf32> to vector<1x8xf32>
    %199 = vector.broadcast %cst_131 : f32 to vector<1x8xf32>
    %200 = arith.select %196, %198, %199 : vector<1x8xi1>, vector<1x8xf32>
    %201 = arith.addf %194, %200 : vector<1x8xf32>
    %c2_i32 = arith.constant 2 : i32
    %202 = vector.broadcast %c2_i32 : i32 to vector<1x8xi32>
    %203 = arith.cmpi eq, %188, %202 : vector<1x8xi32>
    %cst_132 = arith.constant 0.000000e+00 : f32
    %204 = vector.shape_cast %84 : vector<1x1xf32> to vector<1x1xf32>
    %205 = vector.broadcast %204 : vector<1x1xf32> to vector<1x8xf32>
    %206 = vector.broadcast %cst_132 : f32 to vector<1x8xf32>
    %207 = arith.select %203, %205, %206 : vector<1x8xi1>, vector<1x8xf32>
    %208 = arith.addf %201, %207 : vector<1x8xf32>
    %c3_i32 = arith.constant 3 : i32
    %209 = vector.broadcast %c3_i32 : i32 to vector<1x8xi32>
    %210 = arith.cmpi eq, %188, %209 : vector<1x8xi32>
    %cst_133 = arith.constant 0.000000e+00 : f32
    %211 = vector.shape_cast %113 : vector<1x1xf32> to vector<1x1xf32>
    %212 = vector.broadcast %211 : vector<1x1xf32> to vector<1x8xf32>
    %213 = vector.broadcast %cst_133 : f32 to vector<1x8xf32>
    %214 = arith.select %210, %212, %213 : vector<1x8xi1>, vector<1x8xf32>
    %215 = arith.addf %208, %214 : vector<1x8xf32>
    %c4_i32 = arith.constant 4 : i32
    %216 = vector.broadcast %c4_i32 : i32 to vector<1x8xi32>
    %217 = arith.cmpi eq, %188, %216 : vector<1x8xi32>
    %cst_134 = arith.constant 0.000000e+00 : f32
    %218 = vector.shape_cast %142 : vector<1x1xf32> to vector<1x1xf32>
    %219 = vector.broadcast %218 : vector<1x1xf32> to vector<1x8xf32>
    %220 = vector.broadcast %cst_134 : f32 to vector<1x8xf32>
    %221 = arith.select %217, %219, %220 : vector<1x8xi1>, vector<1x8xf32>
    %222 = arith.addf %215, %221 : vector<1x8xf32>
    %c0_135 = arith.constant 0 : index
    %c0_136 = arith.constant 0 : index
    %c0_137 = arith.constant 0 : index
    %223 = vector.load %arg22[%c0_135, %c0_136, %c0_137] : memref<1x1x8xf32, #tpu.memory_space<vmem>>, vector<1x1x8xf32>
    %224 = vector.shape_cast %223 : vector<1x1x8xf32> to vector<1x8xf32>
    %225 = vector.shape_cast %222 : vector<1x8xf32> to vector<1x1x8xf32>
    tpu.vector_store %arg22[%c0_135, %c0_136, %c0_137], %225 {strides = array<i32>} : memref<1x1x8xf32, #tpu.memory_space<vmem>>, vector<1x1x8xf32>,
    return
  }
  func.func @transform_0(%arg0: i32) -> (i32, i32, i32) {
    %c0_i32 = arith.constant 0 : i32
    %c0_i32_0 = arith.constant 0 : i32
    %c0_i32_1 = arith.constant 0 : i32
    return %arg0, %c0_i32, %c0_i32_0 : i32, i32, i32
  }
  func.func @transform_1(%arg0: i32) -> (i32, i32) {
    %c0_i32 = arith.constant 0 : i32
    %c0_i32_0 = arith.constant 0 : i32
    %c0_i32_1 = arith.constant 0 : i32
    return %c0_i32, %c0_i32_0 : i32, i32
  }
  func.func @transform_2(%arg0: i32) -> (i32, i32) {
    %c0_i32 = arith.constant 0 : i32
    %c0_i32_0 = arith.constant 0 : i32
    %c0_i32_1 = arith.constant 0 : i32
    return %c0_i32, %c0_i32_0 : i32, i32
  }
  func.func @transform_3(%arg0: i32) -> (i32, i32) {
    %c0_i32 = arith.constant 0 : i32
    %c0_i32_0 = arith.constant 0 : i32
    %c0_i32_1 = arith.constant 0 : i32
    return %c0_i32, %c0_i32_0 : i32, i32
  }
  func.func @transform_4(%arg0: i32) -> (i32, i32) {
    %c0_i32 = arith.constant 0 : i32
    %c0_i32_0 = arith.constant 0 : i32
    %c0_i32_1 = arith.constant 0 : i32
    return %c0_i32, %c0_i32_0 : i32, i32
  }
  func.func @transform_5(%arg0: i32) -> (i32, i32) {
    %c0_i32 = arith.constant 0 : i32
    %c0_i32_0 = arith.constant 0 : i32
    %c0_i32_1 = arith.constant 0 : i32
    return %c0_i32, %c0_i32_0 : i32, i32
  }
  func.func @transform_6(%arg0: i32) -> (i32, i32) {
    %c0_i32 = arith.constant 0 : i32
    %c0_i32_0 = arith.constant 0 : i32
    %c0_i32_1 = arith.constant 0 : i32
    return %c0_i32, %c0_i32_0 : i32, i32
  }
  func.func @transform_7(%arg0: i32) -> (i32, i32, i32) {
    %c0_i32 = arith.constant 0 : i32
    %c0_i32_0 = arith.constant 0 : i32
    %c0_i32_1 = arith.constant 0 : i32
    %c0_i32_2 = arith.constant 0 : i32
    return %c0_i32, %c0_i32_0, %c0_i32_1 : i32, i32, i32
  }
  func.func @transform_8(%arg0: i32) -> (i32, i32, i32) {
    %c0_i32 = arith.constant 0 : i32
    %c0_i32_0 = arith.constant 0 : i32
    %c0_i32_1 = arith.constant 0 : i32
    %c0_i32_2 = arith.constant 0 : i32
    return %c0_i32, %c0_i32_0, %c0_i32_1 : i32, i32, i32
  }
  func.func @transform_9(%arg0: i32) -> (i32, i32, i32) {
    %c0_i32 = arith.constant 0 : i32
    %c0_i32_0 = arith.constant 0 : i32
    %c0_i32_1 = arith.constant 0 : i32
    %c0_i32_2 = arith.constant 0 : i32
    return %c0_i32, %c0_i32_0, %c0_i32_1 : i32, i32, i32
  }
  func.func @transform_10(%arg0: i32) -> (i32, i32, i32) {
    %c0_i32 = arith.constant 0 : i32
    %c0_i32_0 = arith.constant 0 : i32
    %c0_i32_1 = arith.constant 0 : i32
    %c0_i32_2 = arith.constant 0 : i32
    return %c0_i32, %c0_i32_0, %c0_i32_1 : i32, i32, i32
  }
  func.func @transform_11(%arg0: i32) -> (i32, i32, i32) {
    %c0_i32 = arith.constant 0 : i32
    %c0_i32_0 = arith.constant 0 : i32
    %c0_i32_1 = arith.constant 0 : i32
    %c0_i32_2 = arith.constant 0 : i32
    return %c0_i32, %c0_i32_0, %c0_i32_1 : i32, i32, i32
  }
  func.func @transform_12(%arg0: i32) -> (i32, i32, i32) {
    %c0_i32 = arith.constant 0 : i32
    %c0_i32_0 = arith.constant 0 : i32
    %c0_i32_1 = arith.constant 0 : i32
    %c0_i32_2 = arith.constant 0 : i32
    return %c0_i32, %c0_i32_0, %c0_i32_1 : i32, i32, i32
  }
  func.func @transform_13(%arg0: i32) -> (i32, i32) {
    %c0_i32 = arith.constant 0 : i32
    %c0_i32_0 = arith.constant 0 : i32
    %c0_i32_1 = arith.constant 0 : i32
    return %c0_i32, %c0_i32_0 : i32, i32
  }
  func.func @transform_14(%arg0: i32) -> (i32, i32) {
    %c0_i32 = arith.constant 0 : i32
    %c0_i32_0 = arith.constant 0 : i32
    %c0_i32_1 = arith.constant 0 : i32
    return %c0_i32, %c0_i32_0 : i32, i32
  }
  func.func @transform_15(%arg0: i32) -> (i32, i32) {
    %c0_i32 = arith.constant 0 : i32
    %c0_i32_0 = arith.constant 0 : i32
    %c0_i32_1 = arith.constant 0 : i32
    return %c0_i32, %c0_i32_0 : i32, i32
  }
  func.func @transform_16(%arg0: i32) -> (i32, i32) {
    %c0_i32 = arith.constant 0 : i32
    %c0_i32_0 = arith.constant 0 : i32
    %c0_i32_1 = arith.constant 0 : i32
    return %c0_i32, %c0_i32_0 : i32, i32
  }
  func.func @transform_17(%arg0: i32) -> (i32, i32) {
    %c0_i32 = arith.constant 0 : i32
    %c0_i32_0 = arith.constant 0 : i32
    %c0_i32_1 = arith.constant 0 : i32
    return %c0_i32, %c0_i32_0 : i32, i32
  }
  func.func @transform_18(%arg0: i32) -> (i32, i32) {
    %c0_i32 = arith.constant 0 : i32
    %c0_i32_0 = arith.constant 0 : i32
    %c0_i32_1 = arith.constant 0 : i32
    return %c0_i32, %c0_i32_0 : i32, i32
  }
  func.func @transform_19(%arg0: i32) -> (i32, i32) {
    %c0_i32 = arith.constant 0 : i32
    %c0_i32_0 = arith.constant 0 : i32
    %c0_i32_1 = arith.constant 0 : i32
    return %c0_i32, %c0_i32_0 : i32, i32
  }
  func.func @transform_20(%arg0: i32) -> (i32, i32) {
    %c0_i32 = arith.constant 0 : i32
    %c0_i32_0 = arith.constant 0 : i32
    %c0_i32_1 = arith.constant 0 : i32
    return %c0_i32, %c0_i32_0 : i32, i32
  }
  func.func @transform_21(%arg0: i32) -> (i32, i32, i32) {
    %c0_i32 = arith.constant 0 : i32
    %c0_i32_0 = arith.constant 0 : i32
    %c0_i32_1 = arith.constant 0 : i32
    return %arg0, %c0_i32, %c0_i32_0 : i32, i32, i32
  }
}

module attributes {stable_mosaic.version = 11 : i64} {
  func.func @_encoder_layer_kernel(%arg0: i32, %arg1: memref<1x8x32xf32, #tpu.memory_space<vmem>>, %arg2: memref<32x96xf32, #tpu.memory_space<vmem>>, %arg3: memref<1x96xf32, #tpu.memory_space<vmem>>, %arg4: memref<32x32xf32, #tpu.memory_space<vmem>>, %arg5: memref<1x32xf32, #tpu.memory_space<vmem>>, %arg6: memref<32x128xf32, #tpu.memory_space<vmem>>, %arg7: memref<1x128xf32, #tpu.memory_space<vmem>>, %arg8: memref<128x32xf32, #tpu.memory_space<vmem>>, %arg9: memref<1x32xf32, #tpu.memory_space<vmem>>, %arg10: memref<1x32xf32, #tpu.memory_space<vmem>>, %arg11: memref<1x32xf32, #tpu.memory_space<vmem>>, %arg12: memref<1x32xf32, #tpu.memory_space<vmem>>, %arg13: memref<1x32xf32, #tpu.memory_space<vmem>>, %arg14: memref<1x8x32xf32, #tpu.memory_space<vmem>>) attributes {dimension_semantics = [#tpu.dimension_semantics<parallel>], iteration_bounds = array<i64: 2>, scalar_prefetch = 0 : i64, scratch_operands = 0 : i64, tpu.core_type = #tpu.core_type<tc>, window_params = [{transform_indices = @transform_0, window_bounds = array<i64: 1, 8, 32>}, {pipeline_mode = #tpu.pipeline_mode<synchronous>, transform_indices = @transform_1, window_bounds = array<i64: 32, 96>}, {pipeline_mode = #tpu.pipeline_mode<synchronous>, transform_indices = @transform_2, window_bounds = array<i64: 1, 96>}, {pipeline_mode = #tpu.pipeline_mode<synchronous>, transform_indices = @transform_3, window_bounds = array<i64: 32, 32>}, {pipeline_mode = #tpu.pipeline_mode<synchronous>, transform_indices = @transform_4, window_bounds = array<i64: 1, 32>}, {pipeline_mode = #tpu.pipeline_mode<synchronous>, transform_indices = @transform_5, window_bounds = array<i64: 32, 128>}, {pipeline_mode = #tpu.pipeline_mode<synchronous>, transform_indices = @transform_6, window_bounds = array<i64: 1, 128>}, {pipeline_mode = #tpu.pipeline_mode<synchronous>, transform_indices = @transform_7, window_bounds = array<i64: 128, 32>}, {pipeline_mode = #tpu.pipeline_mode<synchronous>, transform_indices = @transform_8, window_bounds = array<i64: 1, 32>}, {pipeline_mode = #tpu.pipeline_mode<synchronous>, transform_indices = @transform_9, window_bounds = array<i64: 1, 32>}, {pipeline_mode = #tpu.pipeline_mode<synchronous>, transform_indices = @transform_10, window_bounds = array<i64: 1, 32>}, {pipeline_mode = #tpu.pipeline_mode<synchronous>, transform_indices = @transform_11, window_bounds = array<i64: 1, 32>}, {pipeline_mode = #tpu.pipeline_mode<synchronous>, transform_indices = @transform_12, window_bounds = array<i64: 1, 32>}, {transform_indices = @transform_13, window_bounds = array<i64: 1, 8, 32>}]} {
    %c0 = arith.constant 0 : index
    %c0_0 = arith.constant 0 : index
    %c0_1 = arith.constant 0 : index
    %0 = vector.load %arg1[%c0, %c0_0, %c0_1] : memref<1x8x32xf32, #tpu.memory_space<vmem>>, vector<1x8x32xf32>
    %1 = vector.shape_cast %0 : vector<1x8x32xf32> to vector<8x32xf32>
    %c0_2 = arith.constant 0 : index
    %c0_3 = arith.constant 0 : index
    %2 = vector.load %arg2[%c0_2, %c0_3] : memref<32x96xf32, #tpu.memory_space<vmem>>, vector<32x96xf32>
    %cst = arith.constant dense<0.000000e+00> : vector<8x96xf32>
    %3 = tpu.matmul %1, %2, %cst {dimension_numbers = #tpu.dot_dimension_numbers<[1], [0], [0], [1], [0, 0, 1, 1], [], []>} : vector<8x32xf32>, vector<32x96xf32>, vector<8x96xf32> -> vector<8x96xf32>
    %c0_4 = arith.constant 0 : index
    %c0_5 = arith.constant 0 : index
    %4 = vector.load %arg3[%c0_4, %c0_5] : memref<1x96xf32, #tpu.memory_space<vmem>>, vector<1x96xf32>
    %5 = vector.broadcast %4 : vector<1x96xf32> to vector<8x96xf32>
    %6 = arith.addf %3, %5 : vector<8x96xf32>
    %7 = vector.extract_strided_slice %6 {offsets = [0, 0], sizes = [8, 32], strides = [1, 1]} : vector<8x96xf32> to vector<8x32xf32>
    %8 = vector.extract_strided_slice %6 {offsets = [0, 32], sizes = [8, 32], strides = [1, 1]} : vector<8x96xf32> to vector<8x32xf32>
    %9 = vector.extract_strided_slice %6 {offsets = [0, 64], sizes = [8, 32], strides = [1, 1]} : vector<8x96xf32> to vector<8x32xf32>
    %c0_6 = arith.constant 0 : index
    %c0_7 = arith.constant 0 : index
    %10 = vector.load %arg4[%c0_6, %c0_7] : memref<32x32xf32, #tpu.memory_space<vmem>>, vector<32x32xf32>
    %cst_8 = arith.constant 0.000000e+00 : f32
    %11 = vector.broadcast %cst_8 : f32 to vector<8x32xf32>
    %12 = vector.extract_strided_slice %7 {offsets = [0, 0], sizes = [8, 8], strides = [1, 1]} : vector<8x32xf32> to vector<8x8xf32>
    %cst_9 = arith.constant 0.353553385 : f32
    %13 = vector.broadcast %cst_9 : f32 to vector<8x8xf32>
    %14 = arith.mulf %12, %13 : vector<8x8xf32>
    %15 = vector.extract_strided_slice %8 {offsets = [0, 0], sizes = [8, 8], strides = [1, 1]} : vector<8x32xf32> to vector<8x8xf32>
    %16 = vector.extract_strided_slice %9 {offsets = [0, 0], sizes = [8, 8], strides = [1, 1]} : vector<8x32xf32> to vector<8x8xf32>
    %cst_10 = arith.constant dense<0.000000e+00> : vector<8x8xf32>
    %17 = tpu.matmul %14, %15, %cst_10 {dimension_numbers = #tpu.dot_dimension_numbers<[1], [1], [0], [0], [0, 0, 1, 0], [], []>} : vector<8x8xf32>, vector<8x8xf32>, vector<8x8xf32> -> vector<8x8xf32>
    %cst_11 = arith.constant dense<0xFF800000> : vector<8xf32>
    %18 = vector.multi_reduction <maximumf>, %17, %cst_11 [1] : vector<8x8xf32> to vector<8xf32>
    %19 = vector.shape_cast %18 : vector<8xf32> to vector<8x1xf32>
    %20 = vector.broadcast %19 : vector<8x1xf32> to vector<8x8xf32>
    %21 = arith.subf %17, %20 : vector<8x8xf32>
    %22 = math.exp %21 : vector<8x8xf32>
    %cst_12 = arith.constant dense<0.000000e+00> : vector<8xf32>
    %23 = vector.multi_reduction <add>, %22, %cst_12 [1] : vector<8x8xf32> to vector<8xf32>
    %24 = vector.shape_cast %23 : vector<8xf32> to vector<8x1xf32>
    %25 = vector.broadcast %24 : vector<8x1xf32> to vector<8x8xf32>
    %26 = arith.divf %22, %25 : vector<8x8xf32>
    %cst_13 = arith.constant dense<0.000000e+00> : vector<8x8xf32>
    %27 = tpu.matmul %26, %16, %cst_13 {dimension_numbers = #tpu.dot_dimension_numbers<[1], [0], [0], [1], [0, 0, 1, 1], [], []>} : vector<8x8xf32>, vector<8x8xf32>, vector<8x8xf32> -> vector<8x8xf32>
    %28 = vector.extract_strided_slice %10 {offsets = [0, 0], sizes = [8, 32], strides = [1, 1]} : vector<32x32xf32> to vector<8x32xf32>
    %cst_14 = arith.constant dense<0.000000e+00> : vector<8x32xf32>
    %29 = tpu.matmul %27, %28, %cst_14 {dimension_numbers = #tpu.dot_dimension_numbers<[1], [0], [0], [1], [0, 0, 1, 1], [], []>} : vector<8x8xf32>, vector<8x32xf32>, vector<8x32xf32> -> vector<8x32xf32>
    %30 = arith.addf %11, %29 : vector<8x32xf32>
    %31 = vector.extract_strided_slice %7 {offsets = [0, 8], sizes = [8, 8], strides = [1, 1]} : vector<8x32xf32> to vector<8x8xf32>
    %cst_15 = arith.constant 0.353553385 : f32
    %32 = vector.broadcast %cst_15 : f32 to vector<8x8xf32>
    %33 = arith.mulf %31, %32 : vector<8x8xf32>
    %34 = vector.extract_strided_slice %8 {offsets = [0, 8], sizes = [8, 8], strides = [1, 1]} : vector<8x32xf32> to vector<8x8xf32>
    %35 = vector.extract_strided_slice %9 {offsets = [0, 8], sizes = [8, 8], strides = [1, 1]} : vector<8x32xf32> to vector<8x8xf32>
    %cst_16 = arith.constant dense<0.000000e+00> : vector<8x8xf32>
    %36 = tpu.matmul %33, %34, %cst_16 {dimension_numbers = #tpu.dot_dimension_numbers<[1], [1], [0], [0], [0, 0, 1, 0], [], []>} : vector<8x8xf32>, vector<8x8xf32>, vector<8x8xf32> -> vector<8x8xf32>
    %cst_17 = arith.constant dense<0xFF800000> : vector<8xf32>
    %37 = vector.multi_reduction <maximumf>, %36, %cst_17 [1] : vector<8x8xf32> to vector<8xf32>
    %38 = vector.shape_cast %37 : vector<8xf32> to vector<8x1xf32>
    %39 = vector.broadcast %38 : vector<8x1xf32> to vector<8x8xf32>
    %40 = arith.subf %36, %39 : vector<8x8xf32>
    %41 = math.exp %40 : vector<8x8xf32>
    %cst_18 = arith.constant dense<0.000000e+00> : vector<8xf32>
    %42 = vector.multi_reduction <add>, %41, %cst_18 [1] : vector<8x8xf32> to vector<8xf32>
    %43 = vector.shape_cast %42 : vector<8xf32> to vector<8x1xf32>
    %44 = vector.broadcast %43 : vector<8x1xf32> to vector<8x8xf32>
    %45 = arith.divf %41, %44 : vector<8x8xf32>
    %cst_19 = arith.constant dense<0.000000e+00> : vector<8x8xf32>
    %46 = tpu.matmul %45, %35, %cst_19 {dimension_numbers = #tpu.dot_dimension_numbers<[1], [0], [0], [1], [0, 0, 1, 1], [], []>} : vector<8x8xf32>, vector<8x8xf32>, vector<8x8xf32> -> vector<8x8xf32>
    %47 = vector.extract_strided_slice %10 {offsets = [8, 0], sizes = [8, 32], strides = [1, 1]} : vector<32x32xf32> to vector<8x32xf32>
    %cst_20 = arith.constant dense<0.000000e+00> : vector<8x32xf32>
    %48 = tpu.matmul %46, %47, %cst_20 {dimension_numbers = #tpu.dot_dimension_numbers<[1], [0], [0], [1], [0, 0, 1, 1], [], []>} : vector<8x8xf32>, vector<8x32xf32>, vector<8x32xf32> -> vector<8x32xf32>
    %49 = arith.addf %30, %48 : vector<8x32xf32>
    %50 = vector.extract_strided_slice %7 {offsets = [0, 16], sizes = [8, 8], strides = [1, 1]} : vector<8x32xf32> to vector<8x8xf32>
    %cst_21 = arith.constant 0.353553385 : f32
    %51 = vector.broadcast %cst_21 : f32 to vector<8x8xf32>
    %52 = arith.mulf %50, %51 : vector<8x8xf32>
    %53 = vector.extract_strided_slice %8 {offsets = [0, 16], sizes = [8, 8], strides = [1, 1]} : vector<8x32xf32> to vector<8x8xf32>
    %54 = vector.extract_strided_slice %9 {offsets = [0, 16], sizes = [8, 8], strides = [1, 1]} : vector<8x32xf32> to vector<8x8xf32>
    %cst_22 = arith.constant dense<0.000000e+00> : vector<8x8xf32>
    %55 = tpu.matmul %52, %53, %cst_22 {dimension_numbers = #tpu.dot_dimension_numbers<[1], [1], [0], [0], [0, 0, 1, 0], [], []>} : vector<8x8xf32>, vector<8x8xf32>, vector<8x8xf32> -> vector<8x8xf32>
    %cst_23 = arith.constant dense<0xFF800000> : vector<8xf32>
    %56 = vector.multi_reduction <maximumf>, %55, %cst_23 [1] : vector<8x8xf32> to vector<8xf32>
    %57 = vector.shape_cast %56 : vector<8xf32> to vector<8x1xf32>
    %58 = vector.broadcast %57 : vector<8x1xf32> to vector<8x8xf32>
    %59 = arith.subf %55, %58 : vector<8x8xf32>
    %60 = math.exp %59 : vector<8x8xf32>
    %cst_24 = arith.constant dense<0.000000e+00> : vector<8xf32>
    %61 = vector.multi_reduction <add>, %60, %cst_24 [1] : vector<8x8xf32> to vector<8xf32>
    %62 = vector.shape_cast %61 : vector<8xf32> to vector<8x1xf32>
    %63 = vector.broadcast %62 : vector<8x1xf32> to vector<8x8xf32>
    %64 = arith.divf %60, %63 : vector<8x8xf32>
    %cst_25 = arith.constant dense<0.000000e+00> : vector<8x8xf32>
    %65 = tpu.matmul %64, %54, %cst_25 {dimension_numbers = #tpu.dot_dimension_numbers<[1], [0], [0], [1], [0, 0, 1, 1], [], []>} : vector<8x8xf32>, vector<8x8xf32>, vector<8x8xf32> -> vector<8x8xf32>
    %66 = vector.extract_strided_slice %10 {offsets = [16, 0], sizes = [8, 32], strides = [1, 1]} : vector<32x32xf32> to vector<8x32xf32>
    %cst_26 = arith.constant dense<0.000000e+00> : vector<8x32xf32>
    %67 = tpu.matmul %65, %66, %cst_26 {dimension_numbers = #tpu.dot_dimension_numbers<[1], [0], [0], [1], [0, 0, 1, 1], [], []>} : vector<8x8xf32>, vector<8x32xf32>, vector<8x32xf32> -> vector<8x32xf32>
    %68 = arith.addf %49, %67 : vector<8x32xf32>
    %69 = vector.extract_strided_slice %7 {offsets = [0, 24], sizes = [8, 8], strides = [1, 1]} : vector<8x32xf32> to vector<8x8xf32>
    %cst_27 = arith.constant 0.353553385 : f32
    %70 = vector.broadcast %cst_27 : f32 to vector<8x8xf32>
    %71 = arith.mulf %69, %70 : vector<8x8xf32>
    %72 = vector.extract_strided_slice %8 {offsets = [0, 24], sizes = [8, 8], strides = [1, 1]} : vector<8x32xf32> to vector<8x8xf32>
    %73 = vector.extract_strided_slice %9 {offsets = [0, 24], sizes = [8, 8], strides = [1, 1]} : vector<8x32xf32> to vector<8x8xf32>
    %cst_28 = arith.constant dense<0.000000e+00> : vector<8x8xf32>
    %74 = tpu.matmul %71, %72, %cst_28 {dimension_numbers = #tpu.dot_dimension_numbers<[1], [1], [0], [0], [0, 0, 1, 0], [], []>} : vector<8x8xf32>, vector<8x8xf32>, vector<8x8xf32> -> vector<8x8xf32>
    %cst_29 = arith.constant dense<0xFF800000> : vector<8xf32>
    %75 = vector.multi_reduction <maximumf>, %74, %cst_29 [1] : vector<8x8xf32> to vector<8xf32>
    %76 = vector.shape_cast %75 : vector<8xf32> to vector<8x1xf32>
    %77 = vector.broadcast %76 : vector<8x1xf32> to vector<8x8xf32>
    %78 = arith.subf %74, %77 : vector<8x8xf32>
    %79 = math.exp %78 : vector<8x8xf32>
    %cst_30 = arith.constant dense<0.000000e+00> : vector<8xf32>
    %80 = vector.multi_reduction <add>, %79, %cst_30 [1] : vector<8x8xf32> to vector<8xf32>
    %81 = vector.shape_cast %80 : vector<8xf32> to vector<8x1xf32>
    %82 = vector.broadcast %81 : vector<8x1xf32> to vector<8x8xf32>
    %83 = arith.divf %79, %82 : vector<8x8xf32>
    %cst_31 = arith.constant dense<0.000000e+00> : vector<8x8xf32>
    %84 = tpu.matmul %83, %73, %cst_31 {dimension_numbers = #tpu.dot_dimension_numbers<[1], [0], [0], [1], [0, 0, 1, 1], [], []>} : vector<8x8xf32>, vector<8x8xf32>, vector<8x8xf32> -> vector<8x8xf32>
    %85 = vector.extract_strided_slice %10 {offsets = [24, 0], sizes = [8, 32], strides = [1, 1]} : vector<32x32xf32> to vector<8x32xf32>
    %cst_32 = arith.constant dense<0.000000e+00> : vector<8x32xf32>
    %86 = tpu.matmul %84, %85, %cst_32 {dimension_numbers = #tpu.dot_dimension_numbers<[1], [0], [0], [1], [0, 0, 1, 1], [], []>} : vector<8x8xf32>, vector<8x32xf32>, vector<8x32xf32> -> vector<8x32xf32>
    %87 = arith.addf %68, %86 : vector<8x32xf32>
    %c0_33 = arith.constant 0 : index
    %c0_34 = arith.constant 0 : index
    %88 = vector.load %arg5[%c0_33, %c0_34] : memref<1x32xf32, #tpu.memory_space<vmem>>, vector<1x32xf32>
    %89 = vector.broadcast %88 : vector<1x32xf32> to vector<8x32xf32>
    %90 = arith.addf %87, %89 : vector<8x32xf32>
    %91 = arith.addf %1, %90 : vector<8x32xf32>
    %c0_35 = arith.constant 0 : index
    %c0_36 = arith.constant 0 : index
    %92 = vector.load %arg10[%c0_35, %c0_36] : memref<1x32xf32, #tpu.memory_space<vmem>>, vector<1x32xf32>
    %c0_37 = arith.constant 0 : index
    %c0_38 = arith.constant 0 : index
    %93 = vector.load %arg11[%c0_37, %c0_38] : memref<1x32xf32, #tpu.memory_space<vmem>>, vector<1x32xf32>
    %cst_39 = arith.constant dense<0.000000e+00> : vector<8xf32>
    %94 = vector.multi_reduction <add>, %91, %cst_39 [1] : vector<8x32xf32> to vector<8xf32>
    %95 = vector.shape_cast %94 : vector<8xf32> to vector<8x1xf32>
    %cst_40 = arith.constant 3.200000e+01 : f32
    %96 = vector.broadcast %cst_40 : f32 to vector<8x1xf32>
    %97 = arith.divf %95, %96 : vector<8x1xf32>
    %98 = vector.broadcast %97 : vector<8x1xf32> to vector<8x32xf32>
    %99 = arith.subf %91, %98 : vector<8x32xf32>
    %100 = arith.mulf %99, %99 : vector<8x32xf32>
    %cst_41 = arith.constant dense<0.000000e+00> : vector<8xf32>
    %101 = vector.multi_reduction <add>, %100, %cst_41 [1] : vector<8x32xf32> to vector<8xf32>
    %102 = vector.shape_cast %101 : vector<8xf32> to vector<8x1xf32>
    %cst_42 = arith.constant 3.200000e+01 : f32
    %103 = vector.broadcast %cst_42 : f32 to vector<8x1xf32>
    %104 = arith.divf %102, %103 : vector<8x1xf32>
    %105 = vector.broadcast %97 : vector<8x1xf32> to vector<8x32xf32>
    %106 = arith.subf %91, %105 : vector<8x32xf32>
    %cst_43 = arith.constant 9.99999974E-6 : f32
    %107 = vector.broadcast %cst_43 : f32 to vector<8x1xf32>
    %108 = arith.addf %104, %107 : vector<8x1xf32>
    %109 = math.rsqrt %108 : vector<8x1xf32>
    %110 = vector.broadcast %109 : vector<8x1xf32> to vector<8x32xf32>
    %111 = arith.mulf %106, %110 : vector<8x32xf32>
    %112 = vector.broadcast %92 : vector<1x32xf32> to vector<8x32xf32>
    %113 = arith.mulf %111, %112 : vector<8x32xf32>
    %114 = vector.broadcast %93 : vector<1x32xf32> to vector<8x32xf32>
    %115 = arith.addf %113, %114 : vector<8x32xf32>
    %c0_44 = arith.constant 0 : index
    %c0_45 = arith.constant 0 : index
    %116 = vector.load %arg6[%c0_44, %c0_45] : memref<32x128xf32, #tpu.memory_space<vmem>>, vector<32x128xf32>
    %cst_46 = arith.constant dense<0.000000e+00> : vector<8x128xf32>
    %117 = tpu.matmul %115, %116, %cst_46 {dimension_numbers = #tpu.dot_dimension_numbers<[1], [0], [0], [1], [0, 0, 1, 1], [], []>} : vector<8x32xf32>, vector<32x128xf32>, vector<8x128xf32> -> vector<8x128xf32>
    %c0_47 = arith.constant 0 : index
    %c0_48 = arith.constant 0 : index
    %118 = vector.load %arg7[%c0_47, %c0_48] : memref<1x128xf32, #tpu.memory_space<vmem>>, vector<1x128xf32>
    %119 = vector.broadcast %118 : vector<1x128xf32> to vector<8x128xf32>
    %120 = arith.addf %117, %119 : vector<8x128xf32>
    %cst_49 = arith.constant 0.000000e+00 : f32
    %121 = vector.broadcast %cst_49 : f32 to vector<8x128xf32>
    %122 = arith.maximumf %120, %121 : vector<8x128xf32>
    %c0_50 = arith.constant 0 : index
    %c0_51 = arith.constant 0 : index
    %123 = vector.load %arg8[%c0_50, %c0_51] : memref<128x32xf32, #tpu.memory_space<vmem>>, vector<128x32xf32>
    %cst_52 = arith.constant dense<0.000000e+00> : vector<8x32xf32>
    %124 = tpu.matmul %122, %123, %cst_52 {dimension_numbers = #tpu.dot_dimension_numbers<[1], [0], [0], [1], [0, 0, 1, 1], [], []>} : vector<8x128xf32>, vector<128x32xf32>, vector<8x32xf32> -> vector<8x32xf32>
    %c0_53 = arith.constant 0 : index
    %c0_54 = arith.constant 0 : index
    %125 = vector.load %arg9[%c0_53, %c0_54] : memref<1x32xf32, #tpu.memory_space<vmem>>, vector<1x32xf32>
    %126 = vector.broadcast %125 : vector<1x32xf32> to vector<8x32xf32>
    %127 = arith.addf %124, %126 : vector<8x32xf32>
    %128 = arith.addf %115, %127 : vector<8x32xf32>
    %c0_55 = arith.constant 0 : index
    %c0_56 = arith.constant 0 : index
    %129 = vector.load %arg12[%c0_55, %c0_56] : memref<1x32xf32, #tpu.memory_space<vmem>>, vector<1x32xf32>
    %c0_57 = arith.constant 0 : index
    %c0_58 = arith.constant 0 : index
    %130 = vector.load %arg13[%c0_57, %c0_58] : memref<1x32xf32, #tpu.memory_space<vmem>>, vector<1x32xf32>
    %cst_59 = arith.constant dense<0.000000e+00> : vector<8xf32>
    %131 = vector.multi_reduction <add>, %128, %cst_59 [1] : vector<8x32xf32> to vector<8xf32>
    %132 = vector.shape_cast %131 : vector<8xf32> to vector<8x1xf32>
    %cst_60 = arith.constant 3.200000e+01 : f32
    %133 = vector.broadcast %cst_60 : f32 to vector<8x1xf32>
    %134 = arith.divf %132, %133 : vector<8x1xf32>
    %135 = vector.broadcast %134 : vector<8x1xf32> to vector<8x32xf32>
    %136 = arith.subf %128, %135 : vector<8x32xf32>
    %137 = arith.mulf %136, %136 : vector<8x32xf32>
    %cst_61 = arith.constant dense<0.000000e+00> : vector<8xf32>
    %138 = vector.multi_reduction <add>, %137, %cst_61 [1] : vector<8x32xf32> to vector<8xf32>
    %139 = vector.shape_cast %138 : vector<8xf32> to vector<8x1xf32>
    %cst_62 = arith.constant 3.200000e+01 : f32
    %140 = vector.broadcast %cst_62 : f32 to vector<8x1xf32>
    %141 = arith.divf %139, %140 : vector<8x1xf32>
    %142 = vector.broadcast %134 : vector<8x1xf32> to vector<8x32xf32>
    %143 = arith.subf %128, %142 : vector<8x32xf32>
    %cst_63 = arith.constant 9.99999974E-6 : f32
    %144 = vector.broadcast %cst_63 : f32 to vector<8x1xf32>
    %145 = arith.addf %141, %144 : vector<8x1xf32>
    %146 = math.rsqrt %145 : vector<8x1xf32>
    %147 = vector.broadcast %146 : vector<8x1xf32> to vector<8x32xf32>
    %148 = arith.mulf %143, %147 : vector<8x32xf32>
    %149 = vector.broadcast %129 : vector<1x32xf32> to vector<8x32xf32>
    %150 = arith.mulf %148, %149 : vector<8x32xf32>
    %151 = vector.broadcast %130 : vector<1x32xf32> to vector<8x32xf32>
    %152 = arith.addf %150, %151 : vector<8x32xf32>
    %c0_64 = arith.constant 0 : index
    %c0_65 = arith.constant 0 : index
    %c0_66 = arith.constant 0 : index
    %153 = vector.load %arg14[%c0_64, %c0_65, %c0_66] : memref<1x8x32xf32, #tpu.memory_space<vmem>>, vector<1x8x32xf32>
    %154 = vector.shape_cast %153 : vector<1x8x32xf32> to vector<8x32xf32>
    %155 = vector.shape_cast %152 : vector<8x32xf32> to vector<1x8x32xf32>
    tpu.vector_store %arg14[%c0_64, %c0_65, %c0_66], %155 {strides = array<i32>} : memref<1x8x32xf32, #tpu.memory_space<vmem>>, vector<1x8x32xf32>,
    return
  }
  func.func @transform_0(%arg0: i32) -> (i32, i32, i32) {
    %c0_i32 = arith.constant 0 : i32
    %c0_i32_0 = arith.constant 0 : i32
    %c0_i32_1 = arith.constant 0 : i32
    return %arg0, %c0_i32, %c0_i32_0 : i32, i32, i32
  }
  func.func @transform_1(%arg0: i32) -> (i32, i32) {
    %c0_i32 = arith.constant 0 : i32
    %c0_i32_0 = arith.constant 0 : i32
    %c0_i32_1 = arith.constant 0 : i32
    return %c0_i32, %c0_i32_0 : i32, i32
  }
  func.func @transform_2(%arg0: i32) -> (i32, i32) {
    %c0_i32 = arith.constant 0 : i32
    %c0_i32_0 = arith.constant 0 : i32
    %c0_i32_1 = arith.constant 0 : i32
    return %c0_i32, %c0_i32_0 : i32, i32
  }
  func.func @transform_3(%arg0: i32) -> (i32, i32) {
    %c0_i32 = arith.constant 0 : i32
    %c0_i32_0 = arith.constant 0 : i32
    %c0_i32_1 = arith.constant 0 : i32
    return %c0_i32, %c0_i32_0 : i32, i32
  }
  func.func @transform_4(%arg0: i32) -> (i32, i32) {
    %c0_i32 = arith.constant 0 : i32
    %c0_i32_0 = arith.constant 0 : i32
    %c0_i32_1 = arith.constant 0 : i32
    return %c0_i32, %c0_i32_0 : i32, i32
  }
  func.func @transform_5(%arg0: i32) -> (i32, i32) {
    %c0_i32 = arith.constant 0 : i32
    %c0_i32_0 = arith.constant 0 : i32
    %c0_i32_1 = arith.constant 0 : i32
    return %c0_i32, %c0_i32_0 : i32, i32
  }
  func.func @transform_6(%arg0: i32) -> (i32, i32) {
    %c0_i32 = arith.constant 0 : i32
    %c0_i32_0 = arith.constant 0 : i32
    %c0_i32_1 = arith.constant 0 : i32
    return %c0_i32, %c0_i32_0 : i32, i32
  }
  func.func @transform_7(%arg0: i32) -> (i32, i32) {
    %c0_i32 = arith.constant 0 : i32
    %c0_i32_0 = arith.constant 0 : i32
    %c0_i32_1 = arith.constant 0 : i32
    return %c0_i32, %c0_i32_0 : i32, i32
  }
  func.func @transform_8(%arg0: i32) -> (i32, i32) {
    %c0_i32 = arith.constant 0 : i32
    %c0_i32_0 = arith.constant 0 : i32
    %c0_i32_1 = arith.constant 0 : i32
    return %c0_i32, %c0_i32_0 : i32, i32
  }
  func.func @transform_9(%arg0: i32) -> (i32, i32) {
    %c0_i32 = arith.constant 0 : i32
    %c0_i32_0 = arith.constant 0 : i32
    %c0_i32_1 = arith.constant 0 : i32
    return %c0_i32, %c0_i32_0 : i32, i32
  }
  func.func @transform_10(%arg0: i32) -> (i32, i32) {
    %c0_i32 = arith.constant 0 : i32
    %c0_i32_0 = arith.constant 0 : i32
    %c0_i32_1 = arith.constant 0 : i32
    return %c0_i32, %c0_i32_0 : i32, i32
  }
  func.func @transform_11(%arg0: i32) -> (i32, i32) {
    %c0_i32 = arith.constant 0 : i32
    %c0_i32_0 = arith.constant 0 : i32
    %c0_i32_1 = arith.constant 0 : i32
    return %c0_i32, %c0_i32_0 : i32, i32
  }
  func.func @transform_12(%arg0: i32) -> (i32, i32) {
    %c0_i32 = arith.constant 0 : i32
    %c0_i32_0 = arith.constant 0 : i32
    %c0_i32_1 = arith.constant 0 : i32
    return %c0_i32, %c0_i32_0 : i32, i32
  }
  func.func @transform_13(%arg0: i32) -> (i32, i32, i32) {
    %c0_i32 = arith.constant 0 : i32
    %c0_i32_0 = arith.constant 0 : i32
    %c0_i32_1 = arith.constant 0 : i32
    return %arg0, %c0_i32, %c0_i32_0 : i32, i32, i32
  }
}

</mosaic_0001>

<bundles_post_ra>
// kernel: forward.4
= control target key start
LH: loop header
LB: loop body
LE: loop exit
PB: predicated region body
PF: predicated region fallthrough
CT: control target
= control target key end

     0   :  { %s405_s15 = smov 0   ;;  %s434_s0 = inlined_call_operand.vmem [shape: f32[2,8,16], index: 0, kind: input, shape index: {}]   ;;  %s435_s1 = inlined_call_operand.vmem [shape: f32[16,32], index: 1, kind: input, shape index: {}]   ;;  %s436_s2 = inlined_call_operand.vmem [shape: f32[1,32], index: 2, kind: input, shape index: {}]   ;;  %s437_s3 = inlined_call_operand.vmem [shape: f32[8,32], index: 3, kind: input, shape index: {}]   ;;  %s438_s4 = inlined_call_operand.vmem [shape: f32[2,8,32], index: 4, kind: output, shape index: {}]  }
   0x1 LB: > { %s334_s16 = sadd.s32 4294967295, %s375_s15   ;;  %p338_p0 = scmp.ge.s32.totalorder %s375_s15, 1  ;;  %s375_s15 = sphi %s405_s15, %s14_s15  }
   0x2   : > { %p161_p1 = scmp.lt.s32.totalorder %s375_s15, 3 }
   0x4   : > { %p162_p2 = pnand %p338_p0, %p161_p1 }
   0x5   : > { %v194_v0 = vld [vmem:[%s435_s1] sm:$0xff] (!%p162_p2)  ;;  %v195_v1 = vld [vmem:[%s435_s1 + $0x8] sm:$0xff] (!%p162_p2)  ;;  %p185_p3 = scmp.lt.s32.totalorder (!%p162_p2), %s334_s16, 1  ;;  %v377_v2 = vmov (!%p162_p2), 0.0|0.0   ;;  %vm378_vm0 = vmmov (!%p162_p2), 0   ;;  %v379_v4 = vmov (!%p162_p2), 0.0  }
   0x6   : > { %165 = sbr.rel (%p162_p2) target bundleno = 234 (0xea), region = 36  ;;  %355 = vmatprep.subr.bf16.mxu0 (!%p162_p2), %v377_v2  ;;  %v356_v3 = vpack.c.bf16 (!%p162_p2), %v195_v1, %v194_v0  ;;  %352 = vmatprep.mubr.msk.f32.mxu0 (!%p162_p2), %vm378_vm0, %v379_v4  ;;  %vm203_vm1 = vcmask (!%p162_p2), 130048   ;;  %v341_v6 = vld [vmem:[%s436_s2] ss:$0 sm:$0xff] (!%p162_p2)  ;;  %vm279_vm2 = vcmask (!%p162_p2), 261120  }
   0x7   : > { %v277_v8 = vld [vmem:[%s437_s3] sm:$0xff] (!%p162_p2) }
   0x8   : > { %357 = vmatpush3.bf16.msra.mxu0 (!%p162_p2), %v356_v3 }
   0xd   : > { %s440_s16 = smov (!%p185_p3, %s334_s16), 1 }
   0xe   : > { %s339_s21 = sshll.u32 %s440_s16, 3 }
   0xf   : > { %s188_s24 = scalar_lea.vmem %s434_s0, %s339_s21  ;;  %s192_s5 = scalar_lea.vmem %s438_s4, %s339_s21 }
  0x10   : > { %v193_v5 = vld [vmem:[%s188_s24] sm:$0xff] }
  0x11   : > { %353 = vmatmul.mubr.msk.f32.vlgmr.msra.gmra.mrb[0].mxu0 %vm203_vm1, %v193_v5 }
  0xe4   : > { %v273_v7 = vpop.f32.mrb[0].mxu0 }
  0xe5   : > { %v274_v9 = vadd.f32 %v341_v6, %v273_v7  ;;  %v354_v10 = vpop.f32.mrb[1].mxu0 }
  0xe7   : > { %v278_v11 = vadd.f32 %v277_v8, %v274_v9 }
  0xe9   : > { %280 = vst.msk [vmem:[%s192_s5] sm:$0xff] %vm279_vm2, %v278_v11 }
  0xea PF: > { %s14_s15 = sadd.s32 1, %s375_s15  }
  0xeb   : > { %p11_p4 = scmp.ge.s32.totalorder %s14_s15, 4  }
  0xed   :  { %13 = sbr.rel (!%p11_p4) target bundleno = 1 (0x1), region = 66 }

// kernel: forward.5
= control target key start
LH: loop header
LB: loop body
LE: loop exit
PB: predicated region body
PF: predicated region fallthrough
CT: control target
= control target key end

     0   :  { %s2156_s25 = smov 0   ;;  %s2394_s0 = inlined_call_operand.vmem [shape: f32[2,8,32], index: 0, kind: input, shape index: {}]   ;;  %s2395_s1 = inlined_call_operand.vmem [shape: f32[32,96], index: 1, kind: input, shape index: {}]   ;;  %s2396_s2 = inlined_call_operand.vmem [shape: f32[1,96], index: 2, kind: input, shape index: {}]   ;;  %s2397_s3 = inlined_call_operand.vmem [shape: f32[32,32], index: 3, kind: input, shape index: {}]   ;;  %s2398_s4 = inlined_call_operand.vmem [shape: f32[1,32], index: 4, kind: input, shape index: {}]   ;;  %s2399_s5 = inlined_call_operand.vmem [shape: f32[32,128], index: 5, kind: input, shape index: {}]   ;;  %s2400_s6 = inlined_call_operand.vmem [shape: f32[1,128], index: 6, kind: input, shape index: {}]   ;;  %s2401_s7 = inlined_call_operand.vmem [shape: f32[128,32], index: 7, kind: input, shape index: {}]   ;;  %s2402_s8 = inlined_call_operand.vmem [shape: f32[1,32], index: 8, kind: input, shape index: {}]   ;;  %s2403_s9 = inlined_call_operand.vmem [shape: f32[1,32], index: 9, kind: input, shape index: {}]   ;;  %s2404_s10 = inlined_call_operand.vmem [shape: f32[1,32], index: 10, kind: input, shape index: {}]   ;;  %s2405_s11 = inlined_call_operand.vmem [shape: f32[1,32], index: 11, kind: input, shape index: {}]   ;;  %s2406_s12 = inlined_call_operand.vmem [shape: f32[1,32], index: 12, kind: input, shape index: {}]   ;;  %s2407_s13 = inlined_call_operand.vmem [shape: f32[2,8,32], index: 13, kind: output, shape index: {}]  }
   0x1 LB: > { %s1783_s26 = sadd.s32 4294967295, %s2070_s25   ;;  %p1787_p0 = scmp.ge.s32.totalorder %s2070_s25, 1  ;;  %s2070_s25 = sphi %s2156_s25, %s23_s25  }
   0x2   : > { %p386_p1 = scmp.lt.s32.totalorder %s2070_s25, 3 }
   0x4   : > { %p387_p2 = pnand %p1787_p0, %p386_p1 }
   0x5   : > { %v437_v0 = vld [vmem:[%s2395_s1] sm:$0xff] (!%p387_p2)  ;;  %v438_v1 = vld [vmem:[%s2395_s1 + $0x8] sm:$0xff] (!%p387_p2)  ;;  %v439_v2 = vld [vmem:[%s2395_s1 + $0x10] sm:$0xff] (!%p387_p2)  ;;  %v2072_v3 = vmov (!%p387_p2), 0.0|0.0   ;;  %vm2073_vm0 = vmmov (!%p387_p2), 0   ;;  %v2074_v6 = vmov (!%p387_p2), 0.0  }
   0x6   : > { %390 = sbr.rel (%p387_p2) target bundleno = 4166 (0x1046), region = 72  ;;  %1986 = vmatprep.subr.bf16.mxu0 (!%p387_p2), %v2072_v3  ;;  %v1987_v4 = vpack.c.bf16 (!%p387_p2), %v438_v1, %v437_v0  ;;  %v440_v5 = vld [vmem:[%s2395_s1 + $0x18] sm:$0xff] (!%p387_p2)  ;;  %1877 = vmatprep.mubr.msk.f32.mxu0 (!%p387_p2), %vm2073_vm0, %v2074_v6  ;;  %p428_p3 = scmp.lt.s32.totalorder (!%p387_p2), %s1783_s26, 1  ;;  %vm448_vm1 = vcmask (!%p387_p2), 261120   ;;  %v1790_v9 = vld [vmem:[%s2396_s2] ss:$0 sm:$0xff] (!%p387_p2) }
   0x7   : > { %1905 = vmatprep.subr.mxu1 (!%p387_p2), %v2074_v6  ;;  %1907 = vmatprep.mubr.msk.f32.mxu1 (!%p387_p2), %vm2073_vm0, %v2074_v6  ;;  %v1990_v7 = vpack.c.bf16 (!%p387_p2), %v440_v5, %v439_v2  ;;  %s2075_s24 = smov (!%p387_p2), 64   ;;  %s2076_s27 = smov (!%p387_p2), 96   ;;  %vm530_vm2 = vcmask (!%p387_p2), 64512   ;;  %v522_v29 = vld [vmem:[%s2397_s3] sm:$0xff] (!%p387_p2)  ;;  %v523_v46 = vld [vmem:[%s2397_s3 + $0x8] sm:$0xff] (!%p387_p2)  ;;  %v524_v5 = vld [vmem:[%s2397_s3 + $0x10] sm:$0xff] (!%p387_p2) }
   0x8   : > { %1988 = vmatpush3.bf16.msra.mxu0 (!%p387_p2), %v1987_v4  ;;  %s2077_s28 = smov (!%p387_p2), 88   ;;  %s2078_s29 = smov (!%p387_p2), 120   ;;  %1906 = vmatpush3.msra.mxu1 (!%p387_p2), %v522_v29  ;;  %v1808_v29 = vld [vmem:[%s2398_s4] ss:$0 sm:$0xff] (!%p387_p2) }
   0x9   : > { %1989 = vmatprep.subr.bf16.mxu0 (!%p387_p2), %v2072_v3  ;;  %1915 = vmatprep.subr.mxu1 (!%p387_p2), %v2074_v6  ;;  %s2079_s15 = smov (!%p387_p2), 56   ;;  %s2080_s16 = smov (!%p387_p2), 80  }
   0xa   : > { %s2081_s17 = smov (!%p387_p2), 112   ;;  %s2083_s22 = smov (!%p387_p2), 72  }
   0xb   : > { %s2084_s23 = smov (!%p387_p2), 104  }
   0xc   : > { %1991 = vmatpush3.bf16.msra.mxu0 (!%p387_p2), %v1990_v7 }
   0xd   : > { %s2409_s26 = smov (!%p428_p3, %s1783_s26), 1  ;;  %1880 = vmatprep.subr.mxu0 %v2074_v6 }
   0xe   : > { %s1788_s18 = sshll.u32 %s2409_s26, 3 }
   0xf   : > { %s431_s21 = scalar_lea.vmem %s2394_s0, %s1788_s18  ;;  %s435_s14 = scalar_lea.vmem %s2407_s13, %s1788_s18 }
  0x10   : > { %v2191_v8 = vld [vmem:[%s431_s21] sm:$0xff]  ;;  %s2082_s21 = smov 48  }
  0x11   : > { %1878 = vmatmul.mubr.msk.f32.vlgmr.msra.gmra.mrb[0].mxu0 %vm448_vm1, %v2191_v8 }
  0x12   : > { %1882 = vmatprep.mubr.msk.f32.mxu0 %vm2073_vm0, %v2074_v6 }
  0xe4   : > { %v518_v10 = vpop.f32.mrb[0].mxu0 }
  0xe5   : > { %v2201_v11 = vadd.f32 %v1790_v9, %v518_v10  ;;  %v1879_v12 = vpop.f32.mrb[1].mxu0 }
  0xe7   : > { %617 = vrot.lane.b32.xlu1 %v2201_v11, %s2075_s24  ;;  %528 = vrot.lane.b32.xlu0 %v2201_v11, %s2076_s27  ;;  %v2208_v14 = vmul.f32 0.35355338, %v2201_v11 }
  0xeb   : > { %695 = vrot.lane.b32.xlu1 %v2201_v11, %s2077_s28  ;;  %s2085_s28 = smov 40  }
 0x159   : > { %v529_v13 = vpop.permute.xlu0 %528  ;;  %v618_v15 = vpop.permute.xlu1 %617 }
 0x15a   : > { %1881 = vmatpush3.xpose.msk.msra.mxu0 %vm530_vm2, %v529_v13 }
 0x15b   : > { %1885 = vmatprep.subr.mxu0 %v2074_v6 }
 0x15d   : > { %1883 = vmatmul.mubr.msk.f32.vlgmr.msra.gmra.mrb[2].mxu0 %vm530_vm2, %v2208_v14  ;;  %v696_v24 = vpop.permute.xlu1 %695 }
 0x15e   : > { %1886 = vmatpush3.msra.mxu0 %v618_v15  ;;  %1887 = vmatprep.mubr.msk.f32.mxu0 %vm2073_vm0, %v2074_v6 }
 0x15f   : > { %1890 = vmatprep.subr.mxu0 %v2074_v6 }
 0x230   : > { %v602_v16 = vpop.f32.mrb[2].mxu0 }
 0x231   : > { %v1884_v17 = vpop.f32.mrb[3].mxu0  ;;  %v606_v18 = vsel %vm530_vm2, %v602_v16, -inf }
 0x232   : > { %607 = vmax.xlane.f32.xlu0 %v606_v18 }
 0x2bf   : > { %v608_v19 = vpop.xlane.xlu0 %607 }
 0x2c0   : > { %v609_v20 = vsub.f32 %v602_v16, %v608_v19  ;;  %v525_v19 = vld [vmem:[%s2397_s3 + $0x18] sm:$0xff] }
 0x2c2   : > { %v610_v21 = vmul.f32 1.442695, %v609_v20 }
 0x2c4   : > { %2044 = vpow2.f32 %v610_v21 }
 0x2ce   : > { %v2045_v22 = vpop.eup %2044 }
 0x2cf   : > { %v612_v23 = vsel %vm530_vm2, %v2045_v22, 0.0 }
 0x2d0   : > { %613 = vadd.xlane.f32.xlu1 %v612_v23 }
 0x2e1   : > { %693 = vrot.lane.b32.xlu1 %v2208_v14, %s2078_s29 }
 0x35d   : > { %v614_v25 = vpop.xlane.xlu1 %613 }
 0x35e   : > { %2046 = vrcp.f32 %v614_v25 }
 0x361   : > { %v694_v28 = vpop.permute.xlu1 %693 }
 0x368   : > { %v2047_v26 = vpop.eup %2046 }
 0x369   : > { %v616_v27 = vmul.f32 %v2047_v26, %v2045_v22 }
 0x36b   : > { %1888 = vmatmul.mubr.msk.f32.vlgmr.msra.gmra.mrb[4].mxu0 %vm530_vm2, %v616_v27 }
 0x36c   : > { %1891 = vmatpush3.xpose.msk.msra.mxu0 %vm530_vm2, %v696_v24  ;;  %1892 = vmatprep.mubr.msk.f32.mxu0 %vm2073_vm0, %v2074_v6 }
 0x36d   : > { %1895 = vmatprep.subr.mxu0 %v2074_v6 }
 0x36f   : > { %1893 = vmatmul.mubr.msk.f32.vlgmr.msra.gmra.mrb[6].mxu0 %vm530_vm2, %v694_v28 }
 0x370   : > { %1897 = vmatprep.mubr.msk.f32.mxu0 %vm2073_vm0, %v2074_v6 }
 0x43e   : > { %v689_v30 = vpop.f32.mrb[4].mxu0 }
 0x43f   : > { %v1889_v31 = vpop.f32.mrb[5].mxu0  ;;  %1908 = vmatmul.mubr.msk.f32.vlgmr.msra.gmra.mrb[0].mxu1 %vm530_vm2, %v689_v30 }
 0x440   : > { %1917 = vmatprep.mubr.msk.f32.mxu1 %vm2073_vm0, %v2074_v6 }
 0x442   : > { %v767_v32 = vpop.f32.mrb[6].mxu0 }
 0x443   : > { %v1894_v33 = vpop.f32.mrb[7].mxu0  ;;  %v771_v34 = vsel %vm530_vm2, %v767_v32, -inf }
 0x444   : > { %772 = vmax.xlane.f32.xlu1 %v771_v34 }
 0x4d1   : > { %v773_v35 = vpop.xlane.xlu1 %772 }
 0x4d2   : > { %v774_v36 = vsub.f32 %v767_v32, %v773_v35 }
 0x4d4   : > { %v775_v37 = vmul.f32 1.442695, %v774_v36 }
 0x4d6   : > { %2048 = vpow2.f32 %v775_v37 }
 0x4e0   : > { %v2049_v38 = vpop.eup %2048 }
 0x4e1   : > { %v777_v39 = vsel %vm530_vm2, %v2049_v38, 0.0 }
 0x4e2   : > { %778 = vadd.xlane.f32.xlu0 %v777_v39 }
 0x4f8   : > { %782 = vrot.lane.b32.xlu0 %v2201_v11, %s2079_s15 }
 0x4fc   : > { %1006 = vrot.lane.b32.xlu0 %v2201_v11, %s2080_s16 }
 0x500   : > { %1004 = vrot.lane.b32.xlu0 %v2208_v14, %s2081_s17 }
 0x512   : > { %v1000_v40 = vpop.f32.mrb[0].mxu1 }
 0x513   : > { %v1909_v41 = vpop.f32.mrb[1].mxu1 }
 0x56f   : > { %v779_v42 = vpop.xlane.xlu0 %778 }
 0x570   : > { %2050 = vrcp.f32 %v779_v42  ;;  %v1524_v42 = vld [vmem:[%s2399_s5 + $0x18] sm:$0xff] }
 0x573   : > { %v783_v43 = vpop.permute.xlu0 %782 }
 0x574   : > { %1896 = vmatpush3.msra.mxu0 %v783_v43 }
 0x575   : > { %1900 = vmatprep.subr.mxu0 %v2074_v6 }
 0x577   : > { %v1007_v47 = vpop.permute.xlu0 %1006 }
 0x57a   : > { %v2051_v44 = vpop.eup %2050 }
 0x57b   : > { %v781_v45 = vmul.f32 %v2051_v44, %v2049_v38  ;;  %v1005_v50 = vpop.permute.xlu0 %1004  ;;  %v1606_v44 = vld [vmem:[%s2401_s7] sm:$0xff] }
 0x57d   : > { %1898 = vmatmul.mubr.msk.f32.vlgmr.msra.gmra.mrb[8].mxu0 %vm530_vm2, %v781_v45  ;;  %v1607_v45 = vld [vmem:[%s2401_s7 + $0x8] sm:$0xff] }
 0x57e   : > { %1901 = vmatpush3.msra.mxu0 %v523_v46  ;;  %1902 = vmatprep.mubr.msk.f32.mxu0 %vm2073_vm0, %v2074_v6  ;;  %v1608_v46 = vld [vmem:[%s2401_s7 + $0x10] sm:$0xff] }
 0x57f   : > { %1910 = vmatprep.subr.mxu0 %v2074_v6 }
 0x650   : > { %v854_v48 = vpop.f32.mrb[8].mxu0 }
 0x651   : > { %v1899_v49 = vpop.f32.mrb[9].mxu0  ;;  %1903 = vmatmul.mubr.msk.f32.vlgmr.msra.gmra.mrb[10].mxu0 %vm530_vm2, %v854_v48  ;;  %v1609_v48 = vld [vmem:[%s2401_s7 + $0x18] sm:$0xff] }
 0x652   : > { %1911 = vmatpush3.xpose.msk.msra.mxu0 %vm530_vm2, %v1007_v47  ;;  %1912 = vmatprep.mubr.msk.f32.mxu0 %vm2073_vm0, %v2074_v6  ;;  %v1999_v47 = vpack.c.bf16 %v1607_v45, %v1606_v44  ;;  %v2002_v49 = vpack.c.bf16 %v1609_v48, %v1608_v46 }
 0x653   : > { %1920 = vmatprep.subr.mxu0 %v2074_v6 }
 0x655   : > { %1913 = vmatmul.mubr.msk.f32.vlgmr.msra.gmra.mrb[12].mxu0 %vm530_vm2, %v1005_v50  ;;  %v1610_v50 = vld [vmem:[%s2401_s7 + $0x20] sm:$0xff] }
 0x656   : > { %1922 = vmatprep.mubr.msk.f32.mxu0 %vm2073_vm0, %v2074_v6  ;;  %1921 = vmatpush3.msra.mxu0 %v524_v5 }
 0x657   : > { %1930 = vmatprep.subr.mxu0 %v2074_v6 }
 0x724   : > { %v927_v51 = vpop.f32.mrb[10].mxu0 }
 0x725   : > { %v1001_v52 = vadd.f32 %v1000_v40, %v927_v51  ;;  %v1904_v53 = vpop.f32.mrb[11].mxu0  ;;  %v1522_v40 = vld [vmem:[%s2399_s5 + $0x8] sm:$0xff] }
 0x726   : > { %v1611_v51 = vld [vmem:[%s2401_s7 + $0x28] sm:$0xff]  ;;  %v1612_v53 = vld [vmem:[%s2401_s7 + $0x30] sm:$0xff] }
 0x728   : > { %v1078_v54 = vpop.f32.mrb[12].mxu0 }
 0x729   : > { %v1914_v55 = vpop.f32.mrb[13].mxu0  ;;  %v1082_v56 = vsel %vm530_vm2, %v1078_v54, -inf }
 0x72a   : > { %1083 = vmax.xlane.f32.xlu1 %v1082_v56  ;;  %v1614_v56 = vld [vmem:[%s2401_s7 + $0x40] sm:$0xff] }
 0x73b   : > { %1093 = vrot.lane.b32.xlu1 %v2201_v11, %s2082_s21 }
 0x73f   : > { %1245 = vrot.lane.b32.xlu1 %v2201_v11, %s2083_s22 }
 0x743   : > { %1243 = vrot.lane.b32.xlu1 %v2208_v14, %s2084_s23 }
 0x7b7   : > { %v1084_v57 = vpop.xlane.xlu1 %1083 }
 0x7b8   : > { %v1085_v58 = vsub.f32 %v1078_v54, %v1084_v57  ;;  %v1613_v54 = vld [vmem:[%s2401_s7 + $0x38] sm:$0xff]  ;;  %v1615_v57 = vld [vmem:[%s2401_s7 + $0x48] sm:$0xff] }
 0x7b9   : > { %v2008_v55 = vpack.c.bf16 %v1613_v54, %v1612_v53 }
 0x7ba   : > { %v1086_v59 = vmul.f32 1.442695, %v1085_v58  ;;  %v2011_v58 = vpack.c.bf16 %v1615_v57, %v1614_v56 }
 0x7bb   : > { %v1094_v60 = vpop.permute.xlu1 %1093 }
 0x7bc   : > { %2052 = vpow2.f32 %v1086_v59  ;;  %1916 = vmatpush3.msra.mxu1 %v1094_v60  ;;  %v1616_v59 = vld [vmem:[%s2401_s7 + $0x50] sm:$0xff]  ;;  %v1617_v60 = vld [vmem:[%s2401_s7 + $0x58] sm:$0xff] }
 0x7bd   : > { %1925 = vmatprep.subr.mxu1 %v2074_v6 }
 0x7bf   : > { %v1246_v1 = vpop.permute.xlu1 %1245 }
 0x7c3   : > { %v1244_v4 = vpop.permute.xlu1 %1243 }
 0x7c6   : > { %v2053_v61 = vpop.eup %2052 }
 0x7c7   : > { %v1088_v62 = vsel %vm530_vm2, %v2053_v61, 0.0 }
 0x7c8   : > { %1089 = vadd.xlane.f32.xlu0 %v1088_v62  ;;  %v1618_v62 = vld [vmem:[%s2401_s7 + $0x60] sm:$0xff] }
 0x855   : > { %v1090_v63 = vpop.xlane.xlu0 %1089 }
 0x856   : > { %2054 = vrcp.f32 %v1090_v63  ;;  %v1619_v63 = vld [vmem:[%s2401_s7 + $0x68] sm:$0xff] }
 0x860   : > { %v2055_v0 = vpop.eup %2054 }
 0x861   : > { %v1092_v2 = vmul.f32 %v2055_v0, %v2053_v61  ;;  %v2014_v61 = vpack.c.bf16 %v1617_v60, %v1616_v59  ;;  %v2017_v0 = vpack.c.bf16 %v1619_v63, %v1618_v62 }
 0x863   : > { %1918 = vmatmul.mubr.msk.f32.vlgmr.msra.gmra.mrb[2].mxu1 %vm530_vm2, %v1092_v2 }
 0x864   : > { %1926 = vmatpush3.xpose.msk.msra.mxu1 %vm530_vm2, %v1246_v1  ;;  %1927 = vmatprep.mubr.msk.f32.mxu1 %vm2073_vm0, %v2074_v6 }
 0x865   : > { %1935 = vmatprep.subr.mxu1 %v2074_v6 }
 0x867   : > { %1928 = vmatmul.mubr.msk.f32.vlgmr.msra.gmra.mrb[4].mxu1 %vm530_vm2, %v1244_v4 }
 0x868   : > { %1937 = vmatprep.mubr.msk.f32.mxu1 %vm2073_vm0, %v2074_v6  ;;  %1936 = vmatpush3.msra.mxu1 %v525_v19 }
 0x869   : > { %1998 = vmatprep.subr.bf16.mxu1 %v2072_v3 }
 0x936   : > { %v1165_v7 = vpop.f32.mrb[2].mxu1 }
 0x937   : > { %v1919_v9 = vpop.f32.mrb[3].mxu1  ;;  %1923 = vmatmul.mubr.msk.f32.vlgmr.msra.gmra.mrb[14].mxu0 %vm530_vm2, %v1165_v7  ;;  %v1809_v7 = vld [vmem:[%s2403_s9] ss:$0 sm:$0xff] }
 0x938   : > { %1932 = vmatprep.mubr.msk.f32.mxu0 %vm2073_vm0, %v2074_v6 }
 0x93a   : > { %v1317_v10 = vpop.f32.mrb[4].mxu1 }
 0x93b   : > { %v1929_v12 = vpop.f32.mrb[5].mxu1  ;;  %v1321_v13 = vsel %vm530_vm2, %v1317_v10, -inf }
 0x93c   : > { %1322 = vmax.xlane.f32.xlu1 %v1321_v13 }
 0x9c9   : > { %v1323_v14 = vpop.xlane.xlu1 %1322 }
 0x9ca   : > { %v1324_v15 = vsub.f32 %v1317_v10, %v1323_v14  ;;  %v1810_v10 = vld [vmem:[%s2404_s10] ss:$0 sm:$0xff]  ;;  %v1621_v14 = vld [vmem:[%s2401_s7 + $0x78] sm:$0xff] }
 0x9cc   : > { %v1325_v16 = vmul.f32 1.442695, %v1324_v15 }
 0x9ce   : > { %2056 = vpow2.f32 %v1325_v16  ;;  %v1811_v16 = vld [vmem:[%s2400_s6] ss:$0 sm:$0xff] }
 0x9d8   : > { %v2057_v17 = vpop.eup %2056 }
 0x9d9   : > { %v1327_v18 = vsel %vm530_vm2, %v2057_v17, 0.0 }
 0x9da   : > { %1328 = vadd.xlane.f32.xlu0 %v1327_v18 }
 0x9f0   : > { %1332 = vrot.lane.b32.xlu0 %v2201_v11, %s2085_s28 }
 0xa0a   : > { %v1238_v20 = vpop.f32.mrb[14].mxu0 }
 0xa0b   : > { %v1242_v21 = vadd.f32 %v1238_v20, %v1001_v52  ;;  %v1924_v22 = vpop.f32.mrb[15].mxu0  ;;  %v2005_v52 = vpack.c.bf16 %v1611_v51, %v1610_v50 }
 0xa67   : > { %v1329_v23 = vpop.xlane.xlu0 %1328 }
 0xa68   : > { %2058 = vrcp.f32 %v1329_v23 }
 0xa6b   : > { %v1333_v24 = vpop.permute.xlu0 %1332 }
 0xa6c   : > { %1931 = vmatpush3.msra.mxu0 %v1333_v24 }
 0xa6d   : > { %1992 = vmatprep.subr.bf16.mxu0 %v2072_v3 }
 0xa72   : > { %v2059_v25 = vpop.eup %2058 }
 0xa73   : > { %v1331_v26 = vmul.f32 %v2059_v25, %v2057_v17 }
 0xa75   : > { %1933 = vmatmul.mubr.msk.f32.vlgmr.msra.gmra.mrb[16].mxu0 %vm530_vm2, %v1331_v26 }
 0xa76   : > { %1948 = vmatprep.mubr.msk.f32.mxu0 %vm2073_vm0, %v2074_v6 }
 0xb48   : > { %v1404_v11 = vpop.f32.mrb[16].mxu0 }
 0xb49   : > { %v1934_v27 = vpop.f32.mrb[17].mxu0  ;;  %1938 = vmatmul.mubr.msk.f32.vlgmr.msra.gmra.mrb[6].mxu1 %vm530_vm2, %v1404_v11 }
 0xb4a   : > { %1983 = vmatprep.mubr.msk.f32.mxu1 %vm2073_vm0, %v2074_v6  ;;  %v1521_v6 = vld [vmem:[%s2399_s5] sm:$0xff]  ;;  %2000 = vmatpush3.bf16.msra.mxu1 %v1999_v47 }
 0xb4b   : > { %v1993_v41 = vpack.c.bf16 %v1522_v40, %v1521_v6  ;;  %2001 = vmatprep.subr.bf16.mxu1 %v2072_v3 }
 0xb4d   : > { %1994 = vmatpush3.bf16.msra.mxu0 %v1993_v41 }
 0xb4e   : > { %1995 = vmatprep.subr.bf16.mxu0 %v2072_v3  ;;  %2003 = vmatpush3.bf16.msra.mxu1 %v2002_v49 }
 0xb4f   : > { %2004 = vmatprep.subr.bf16.mxu1 %v2072_v3 }
 0xb52   : > { %2006 = vmatpush3.bf16.msra.mxu1 %v2005_v52 }
 0xb53   : > { %2007 = vmatprep.subr.bf16.mxu1 %v2072_v3 }
 0xb56   : > { %2009 = vmatpush3.bf16.msra.mxu1 %v2008_v55 }
 0xb57   : > { %2010 = vmatprep.subr.bf16.mxu1 %v2072_v3 }
 0xb5a   : > { %2012 = vmatpush3.bf16.msra.mxu1 %v2011_v58 }
 0xb5b   : > { %2013 = vmatprep.subr.bf16.mxu1 %v2072_v3 }
 0xb5e   : > { %2015 = vmatpush3.bf16.msra.mxu1 %v2014_v61 }
 0xb5f   : > { %2016 = vmatprep.subr.bf16.mxu1 %v2072_v3 }
 0xb62   : > { %2018 = vmatpush3.bf16.msra.mxu1 %v2017_v0 }
 0xb63   : > { %2019 = vmatprep.subr.bf16.mxu1 %v2072_v3  ;;  %v1620_v3 = vld [vmem:[%s2401_s7 + $0x70] sm:$0xff] }
 0xb64   : > { %v2020_v15 = vpack.c.bf16 %v1621_v14, %v1620_v3 }
 0xb66   : > { %2021 = vmatpush3.bf16.msra.mxu1 %v2020_v15 }
 0xc1c   : > { %v1477_v28 = vpop.f32.mrb[6].mxu1 }
 0xc1d   : > { %v1481_v30 = vadd.f32 %v1477_v28, %v1242_v21  ;;  %v1939_v31 = vpop.f32.mrb[7].mxu1  ;;  %v1813_v21 = vld [vmem:[%s2402_s8] ss:$0 sm:$0xff] }
 0xc1f   : > { %v1489_v32 = vadd.f32 %v1808_v29, %v1481_v30 }
 0xc21   : > { %v1490_v33 = vadd.f32 %v1489_v32, %v2191_v8  ;;  %v1523_v8 = vld [vmem:[%s2399_s5 + $0x10] sm:$0xff] }
 0xc22   : > { %v1996_v43 = vpack.c.bf16 %v1524_v42, %v1523_v8 }
 0xc23   : > { %v1493_v34 = vsel %vm448_vm1, %v1490_v33, 0.0 }
 0xc24   : > { %1494 = vadd.xlane.f32.xlu0 %v1493_v34  ;;  %1997 = vmatpush3.bf16.msra.mxu0 %v1996_v43 }
 0xcb1   : > { %v1495_v35 = vpop.xlane.xlu0 %1494 }
 0xcb2   : > { %v1497_v36 = vmul.f32 0.03125, %v1495_v35  ;;  %v1814_v35 = vld [vmem:[%s2405_s11] ss:$0 sm:$0xff] }
 0xcb4   : > { %v1498_v37 = vsub.f32 %v1490_v33, %v1497_v36 }
 0xcb6   : > { %v1499_v38 = vmul.f32 %v1498_v37, %v1498_v37 }
 0xcb8   : > { %v1500_v39 = vsel %vm448_vm1, %v1499_v38, 0.0 }
 0xcb9   : > { %1501 = vadd.xlane.f32.xlu1 %v1500_v39 }
 0xd46   : > { %v1502_v1 = vpop.xlane.xlu1 %1501 }
 0xd47   : > { %v1503_v2 = vmul.f32 0.03125, %v1502_v1 }
 0xd49   : > { %v1504_v4 = vadd.f32 1e-05, %v1503_v2 }
 0xd4b   : > { %2060 = vrsqrt.f32 %v1504_v4 }
 0xd55   : > { %v2061_v5 = vpop.eup %2060 }
 0xd56   : > { %v1506_v9 = vmul.f32 %v2061_v5, %v1498_v37  ;;  %v1815_v37 = vld [vmem:[%s2406_s12] ss:$0 sm:$0xff] }
 0xd58   : > { %v1513_v12 = vmul.f32 %v1809_v7, %v1506_v9 }
 0xd5a   : > { %v1520_v13 = vadd.f32 %v1810_v10, %v1513_v12 }
 0xd5c   : > { %1949 = vmatmul.mubr.msk.f32.vlgmr.msra.gmra.mrb[18].mxu0 %vm448_vm1, %v1520_v13 }
 0xe2f   : > { %v1601_v17 = vpop.f32.mrb[18].mxu0 }
 0xe30   : > { %v1602_v18 = vadd.f32 %v1811_v16, %v1601_v17  ;;  %v1950_v19 = vpop.f32.mrb[19].mxu0 }
 0xe32   : > { %v1605_v20 = vmax.f32 %v1602_v18, 0.0 }
 0xe34   : > { %1984 = vmatmul.mubr.f32.vlgmr.msra.gmra.mrb[8].mxu1 %v1605_v20 }
 0xf07   : > { %v1695_v22 = vpop.f32.mrb[8].mxu1 }
 0xf08   : > { %v1696_v23 = vadd.f32 %v1813_v21, %v1695_v22  ;;  %v1985_v24 = vpop.f32.mrb[9].mxu1 }
 0xf0a   : > { %v1699_v25 = vadd.f32 %v1696_v23, %v1520_v13 }
 0xf0c   : > { %v1702_v26 = vsel %vm448_vm1, %v1699_v25, 0.0 }
 0xf0d   : > { %1703 = vadd.xlane.f32.xlu1 %v1702_v26 }
 0xf9a   : > { %v1704_v11 = vpop.xlane.xlu1 %1703 }
 0xf9b   : > { %v1705_v27 = vmul.f32 0.03125, %v1704_v11 }
 0xf9d   : > { %v1706_v28 = vsub.f32 %v1699_v25, %v1705_v27 }
 0xf9f   : > { %v1707_v29 = vmul.f32 %v1706_v28, %v1706_v28 }
 0xfa1   : > { %v1708_v30 = vsel %vm448_vm1, %v1707_v29, 0.0 }
 0xfa2   : > { %1709 = vadd.xlane.f32.xlu1 %v1708_v30 }
0x102f   : > { %v1710_v31 = vpop.xlane.xlu1 %1709 }
0x1030   : > { %v1711_v32 = vmul.f32 0.03125, %v1710_v31 }
0x1032   : > { %v1712_v33 = vadd.f32 1e-05, %v1711_v32 }
0x1034   : > { %2062 = vrsqrt.f32 %v1712_v33 }
0x103e   : > { %v2063_v34 = vpop.eup %2062 }
0x103f   : > { %v1714_v36 = vmul.f32 %v2063_v34, %v1706_v28 }
0x1041   : > { %v1721_v38 = vmul.f32 %v1814_v35, %v1714_v36 }
0x1043   : > { %v1728_v39 = vadd.f32 %v1815_v37, %v1721_v38 }
0x1045   : > { %1729 = vst.msk [vmem:[%s435_s14] sm:$0xff] %vm448_vm1, %v1728_v39 }
0x1046 PF: > { %s23_s25 = sadd.s32 1, %s2070_s25  }
0x1047   : > { %p20_p4 = scmp.ge.s32.totalorder %s23_s25, 4  }
0x1049   :  { %22 = sbr.rel (!%p20_p4) target bundleno = 1 (0x1), region = 102 }

// kernel: forward.7
= control target key start
LH: loop header
LB: loop body
LE: loop exit
PB: predicated region body
PF: predicated region fallthrough
CT: control target
= control target key end

     0   :  { %s3742_s0 = inlined_call_operand.vmem [shape: f32[2,8,32], index: 0, kind: input, shape index: {}]   ;;  %s3743_s1 = inlined_call_operand.vmem [shape: f32[1,32], index: 1, kind: input, shape index: {}]   ;;  %s3744_s2 = inlined_call_operand.vmem [shape: f32[1,32], index: 2, kind: input, shape index: {}]   ;;  %s3745_s3 = inlined_call_operand.vmem [shape: f32[32,16], index: 3, kind: input, shape index: {}]   ;;  %s3746_s4 = inlined_call_operand.vmem [shape: f32[1,16], index: 4, kind: input, shape index: {}]   ;;  %s3747_s5 = inlined_call_operand.vmem [shape: f32[16,1], index: 5, kind: input, shape index: {}]   ;;  %s3748_s6 = inlined_call_operand.<no memory space> [shape: f32[1,1], index: 6, kind: input, shape index: {}]   ;;  %s3749_s7 = inlined_call_operand.vmem [shape: f32[3,96,32], index: 7, kind: input, shape index: {}]   ;;  %s3750_s8 = inlined_call_operand.vmem [shape: f32[3,1,32], index: 8, kind: input, shape index: {}]   ;;  %s3751_s9 = inlined_call_operand.vmem [shape: f32[3,32,16], index: 9, kind: input, shape index: {}]   ;;  %s3752_s10 = inlined_call_operand.vmem [shape: f32[3,1,16], index: 10, kind: input, shape index: {}]   ;;  %s3753_s11 = inlined_call_operand.vmem [shape: f32[3,16,1], index: 11, kind: input, shape index: {}]   ;;  %s3754_s12 = inlined_call_operand.vmem [shape: f32[3,1,1], index: 12, kind: input, shape index: {}]   ;;  %s3755_s13 = inlined_call_operand.vmem [shape: f32[96,32], index: 13, kind: input, shape index: {}]   ;;  %s3756_s14 = inlined_call_operand.vmem [shape: f32[1,32], index: 14, kind: input, shape index: {}]   ;;  %s3757_s15 = inlined_call_operand.vmem [shape: f32[32,16], index: 15, kind: input, shape index: {}]   ;;  %s3758_s16 = inlined_call_operand.vmem [shape: f32[1,16], index: 16, kind: input, shape index: {}]   ;;  %s3759_s17 = inlined_call_operand.vmem [shape: f32[16,8], index: 17, kind: input, shape index: {}]   ;;  %s3760_s18 = inlined_call_operand.vmem [shape: f32[1,8], index: 18, kind: input, shape index: {}]   ;;  %s3761_s19 = inlined_call_operand.vmem [shape: f32[8,1], index: 19, kind: input, shape index: {}]   ;;  %s3762_s21 = inlined_call_operand.vmem [shape: f32[2,1,8], index: 21, kind: output, shape index: {}]   ;;  %s3763_s20 = inlined_call_operand.<no memory space> [shape: f32[1,1], index: 20, kind: input, shape index: {}]  }
   0x1   :  { %3766 = sst [smem:[#allocation4_spill]] %s3742_s0  ;;  %v26_v0 = vstv %s3748_s6  ;;  %v28_v1 = vstv %s3763_s20 }
   0x2   :  { %3767 = sst [smem:[#allocation5_spill]] %s3743_s1  ;;  %27 = vst [vmem:[#allocation2] sm:$0x1] %v26_v0  ;;  %29 = vst [vmem:[#allocation3] sm:$0x1] %v28_v1 }
   0x3   :  { %3768 = sst [smem:[#allocation6_spill]] %s3744_s2 }
   0x4   :  { %3769 = sst [smem:[#allocation7_spill]] %s3745_s3  ;;  %s3295_s3 = smov 0  }
   0x5   :  { %3770 = sst [smem:[#allocation8_spill]] %s3746_s4 }
   0x6   :  { %3771 = sst [smem:[#allocation9_spill]] %s3747_s5 }
   0x7 LB: > { %s2620_s28 = sadd.s32 4294967295, %s3173_s3   ;;  %p2624_p0 = scmp.ge.s32.totalorder %s3173_s3, 1  ;;  %s3173_s3 = sphi %s3295_s3, %s35_s3  }
   0x8   : > { %p590_p1 = scmp.lt.s32.totalorder %s3173_s3, 3 }
   0xa   : > { %p591_p2 = pnand %p2624_p0, %p590_p1 }
   0xb   : > { %p647_p3 = scmp.lt.s32.totalorder (!%p591_p2), %s2620_s28, 1  ;;  %vm657_vm0 = vcmask (!%p591_p2), 261120   ;;  %s3772_s0 = sld [smem:[#allocation4_spill]] (!%p591_p2)  ;;  %v3175_v12 = vmov (!%p591_p2), 0.0|0.0   ;;  %vm3176_vm1 = vmmov (!%p591_p2), 0   ;;  %v3177_v15 = vmov (!%p591_p2), 0.0  }
   0xc   : > { %594 = sbr.rel (%p591_p2) target bundleno = 3328 (0xd00), region = 104  ;;  %s3773_s22 = sld [smem:[#allocation7_spill]] (!%p591_p2)  ;;  %3026 = vmatprep.subr.bf16.mxu0 (!%p591_p2), %v3175_v12  ;;  %2807 = vmatprep.mubr.msk.f32.mxu0 (!%p591_p2), %vm3176_vm1, %v3177_v15  ;;  %v896_v23 = vld [vmem:[%s3749_s7] sm:$0xff] (!%p591_p2)  ;;  %v897_v24 = vld [vmem:[%s3749_s7 + $0x8] sm:$0xff] (!%p591_p2)  ;;  %v898_v29 = vld [vmem:[%s3749_s7 + $0x10] sm:$0xff] (!%p591_p2)  ;;  %vm789_vm2 = vcmask (!%p591_p2), 130048  }
   0xd   : > { %3032 = vmatprep.subr.bf16.mxu1 (!%p591_p2), %v3175_v12  ;;  %2814 = vmatprep.mubr.msk.f32.mxu1 (!%p591_p2), %vm3176_vm1, %v3177_v15  ;;  %s3774_s20 = sld [smem:[#allocation5_spill]] (!%p591_p2)  ;;  %s3775_s1 = sld [smem:[#allocation6_spill]] (!%p591_p2)  ;;  %v3042_v27 = vpack.c.bf16 (!%p591_p2), %v897_v24, %v896_v23  ;;  %v899_v30 = vld [vmem:[%s3749_s7 + $0x18] sm:$0xff] (!%p591_p2)  ;;  %v900_v41 = vld [vmem:[%s3749_s7 + $0x20] sm:$0xff] (!%p591_p2)  ;;  %v901_v42 = vld [vmem:[%s3749_s7 + $0x28] sm:$0xff] (!%p591_p2)  ;;  %v3178_v57 = vmov (!%p591_p2), 0  }
   0xe   : > { %v3045_v31 = vpack.c.bf16 (!%p591_p2), %v899_v30, %v898_v29  ;;  %s3777_s5 = sld [smem:[#allocation8_spill]] (!%p591_p2)  ;;  %v3036_v47 = vpack.c.bf16 (!%p591_p2), %v901_v42, %v900_v41  ;;  %v902_v49 = vld [vmem:[%s3749_s7 + $0x30] sm:$0xff] (!%p591_p2)  ;;  %v903_v50 = vld [vmem:[%s3749_s7 + $0x38] sm:$0xff] (!%p591_p2)  ;;  %3155 = vset.pattern.permute.xlu1 (!%p591_p2), %v3178_v57  ;;  %3156 = vset.pattern.permute.xlu0 (!%p591_p2), %v3178_v57  ;;  %v2630_v58 = vld [vmem:[#allocation2] ss:$0 sm:$0xff] (!%p591_p2)  ;;  %vm863_vm3 = vcmask (!%p591_p2), 7168  }
   0xf   : > { %v3039_v52 = vpack.c.bf16 (!%p591_p2), %v903_v50, %v902_v49  ;;  %v905_v23 = vld [vmem:[%s3749_s7 + $0x48] sm:$0xff] (!%p591_p2)  ;;  %v1131_v29 = vld [vmem:[%s3751_s9] sm:$0xff] (!%p591_p2)  ;;  %v1133_v42 = vld [vmem:[%s3751_s9 + $0x10] sm:$0xff] (!%p591_p2)  ;;  %vm2450_vm7 = vcmask (!%p591_p2), 64512   ;;  %vm2571_vm13 = vcmask (!%p591_p2), 57344  }
  0x10   : > { %v1132_v30 = vld [vmem:[%s3751_s9 + $0x8] sm:$0xff] (!%p591_p2)  ;;  %v2645_v57 = vld [vmem:[%s3749_s7 + $0xa0] sm:$0xff] (!%p591_p2) }
  0x11   : > { %v2642_v49 = vld [vmem:[%s3749_s7 + $0x88] sm:$0xff] (!%p591_p2) }
  0x12   : > { %v695_v9 = vld [vmem:[%s3773_s22] sm:$0xff] (!%p591_p2)  ;;  %v696_v10 = vld [vmem:[%s3773_s22 + $0x8] sm:$0xff] (!%p591_p2)  ;;  %v697_v11 = vld [vmem:[%s3773_s22 + $0x10] sm:$0xff] (!%p591_p2) }
  0x13   : > { %s3779_s28 = smov (!%p647_p3, %s2620_s28), 1  ;;  %v3027_v13 = vpack.c.bf16 %v696_v10, %v695_v9  ;;  %v698_v14 = vld [vmem:[%s3773_s22 + $0x18] sm:$0xff]  ;;  %v2626_v21 = vld [vmem:[%s3774_s20] ss:$0 sm:$0xff]  ;;  %s3776_s20 = sld [smem:[#allocation9_spill]] }
  0x14   : > { %s2625_s6 = sshll.u32 %s3779_s28, 3  ;;  %v3030_v16 = vpack.c.bf16 %v698_v14, %v697_v11  ;;  %v2627_v25 = vld [vmem:[%s3775_s1] ss:$0 sm:$0xff]  ;;  %s653_s29 = scalar_lea.vmem %s3762_s21, %s3779_s28 }
  0x15   : > { %s650_s4 = scalar_lea.vmem %s3772_s0, %s2625_s6  ;;  %3028 = vmatpush3.bf16.msra.mxu0 %v3027_v13  ;;  %v2628_v40 = vld [vmem:[%s3777_s5] ss:$0 sm:$0xff] }
  0x16   : > { %v654_v2 = vld [vmem:[%s650_s4] sm:$0xff]  ;;  %3029 = vmatprep.subr.bf16.mxu0 %v3175_v12 }
  0x17   : > { %v658_v3 = vsel %vm657_vm0, %v654_v2, 0.0 }
  0x18   : > { %659 = vadd.xlane.f32.xlu0 %v658_v3 }
  0x19   : > { %3031 = vmatpush3.bf16.msra.mxu0 %v3030_v16  ;;  %v780_v33 = vld [vmem:[%s3776_s20] sm:$0xff]  ;;  %v781_v34 = vld [vmem:[%s3776_s20 + $0x8] sm:$0xff] }
  0x1a   : > { %3041 = vmatprep.subr.bf16.mxu0 %v3175_v12  ;;  %v3033_v35 = vpack.c.bf16 %v781_v34, %v780_v33 }
  0x1c   : > { %3034 = vmatpush3.bf16.msra.mxu1 %v3033_v35 }
  0x1d   : > { %3035 = vmatprep.subr.bf16.mxu1 %v3175_v12 }
  0xa5   : > { %v660_v4 = vpop.xlane.xlu0 %659 }
  0xa6   : > { %v662_v5 = vmul.f32 0.03125, %v660_v4 }
  0xa8   : > { %v663_v6 = vsub.f32 %v654_v2, %v662_v5 }
  0xaa   : > { %v664_v7 = vmul.f32 %v663_v6, %v663_v6 }
  0xac   : > { %v665_v8 = vsel %vm657_vm0, %v664_v7, 0.0 }
  0xad   : > { %666 = vadd.xlane.f32.xlu0 %v665_v8 }
 0x13a   : > { %v667_v17 = vpop.xlane.xlu0 %666 }
 0x13b   : > { %v668_v18 = vmul.f32 0.03125, %v667_v17 }
 0x13d   : > { %v669_v19 = vadd.f32 1e-05, %v668_v18 }
 0x13f   : > { %3157 = vrsqrt.f32 %v669_v19 }
 0x149   : > { %v3158_v20 = vpop.eup %3157 }
 0x14a   : > { %v671_v22 = vmul.f32 %v3158_v20, %v663_v6 }
 0x14c   : > { %v678_v26 = vmul.f32 %v2626_v21, %v671_v22  ;;  %v904_v22 = vld [vmem:[%s3749_s7 + $0x40] sm:$0xff] }
 0x14d   : > { %v3048_v24 = vpack.c.bf16 %v905_v23, %v904_v22  ;;  %v2655_v22 = vld [vmem:[%s3751_s9 + $0x30] sm:$0xff]  ;;  %v2656_v23 = vld [vmem:[%s3751_s9 + $0x38] sm:$0xff] }
 0x14e   : > { %v3343_v28 = vadd.f32 %v2627_v25, %v678_v26  ;;  %v906_v25 = vld [vmem:[%s3749_s7 + $0x50] sm:$0xff]  ;;  %v907_v26 = vld [vmem:[%s3749_s7 + $0x58] sm:$0xff] }
 0x150   : > { %2808 = vmatmul.mubr.msk.f32.vlgmr.msra.gmra.mrb[0].mxu0 %vm657_vm0, %v3343_v28  ;;  %v3357_v32 = vrot.slane %v3343_v28, 7  ;;  %v686_v36 = vsel %vm657_vm0, %v3343_v28, 0.0 }
 0x151   : > { %3043 = vmatpush3.bf16.msra.mxu0 %v3042_v27  ;;  %2836 = vmatprep.mubr.msk.f32.mxu0 %vm3176_vm1, %v3177_v15  ;;  %v687_v37 = vrot.slane %v686_v36, 4  ;;  %v3051_v27 = vpack.c.bf16 %v907_v26, %v906_v25 }
 0x152   : > { %3044 = vmatprep.subr.bf16.mxu0 %v3175_v12 }
 0x153   : > { %v688_v38 = vadd.f32 %v687_v37, %v686_v36 }
 0x155   : > { %3046 = vmatpush3.bf16.msra.mxu0 %v3045_v31  ;;  %v689_v39 = vrot.slane %v688_v38, 2  ;;  %v3054_v31 = vpack.c.bf16 %v1132_v30, %v1131_v29 }
 0x156   : > { %3053 = vmatprep.subr.bf16.mxu0 %v3175_v12 }
 0x157   : > { %v690_v43 = vadd.f32 %v689_v39, %v688_v38 }
 0x158   : > { %2837 = vmatmul.mubr.msk.f32.vlgmr.msra.gmra.mrb[2].mxu0 %vm657_vm0, %v3357_v32 }
 0x159   : > { %2858 = vmatprep.mubr.msk.f32.mxu0 %vm3176_vm1, %v3177_v15  ;;  %v691_v51 = vrot.slane %v690_v43, 1  ;;  %3055 = vmatpush3.bf16.msra.mxu0 %v3054_v31  ;;  %v2649_v31 = vld [vmem:[%s3750_s8 + $0x1] sm:$0x1] }
 0x15a   : > { %3056 = vmatprep.subr.bf16.mxu0 %v3175_v12 }
 0x15b   : > { %v692_v53 = vadd.f32 %v691_v51, %v690_v43 }
 0x15d   : > { %v3392_v56 = vmul.f32 0.125, %v692_v53  ;;  %v2643_v53 = vld [vmem:[%s3749_s7 + $0x90] sm:$0xff] }
 0x223   : > { %v775_v44 = vpop.f32.mrb[0].mxu0 }
 0x224   : > { %v776_v45 = vadd.f32 %v2628_v40, %v775_v44  ;;  %v2809_v46 = vpop.f32.mrb[1].mxu0  ;;  %v908_v44 = vld [vmem:[%s3750_s8] sm:$0x1] }
 0x226   : > { %v779_v48 = vmax.f32 %v776_v45, 0.0 }
 0x228   : > { %2815 = vmatmul.mubr.msk.f32.vlgmr.msra.gmra.mrb[0].mxu1 %vm789_vm2, %v779_v48  ;;  %v2641_v48 = vld [vmem:[%s3749_s7 + $0x80] sm:$0xff] }
 0x229   : > { %3037 = vmatpush3.bf16.msra.mxu1 %v3036_v47  ;;  %2825 = vmatprep.mubr.msk.f32.mxu1 %vm3176_vm1, %v3177_v15  ;;  %v3063_v51 = vpack.c.bf16 %v2642_v49, %v2641_v48  ;;  %v2659_v48 = vld [vmem:[%s3753_s11 + $0x10] sm:$0xff]  ;;  %v2660_v49 = vld [vmem:[%s3753_s11 + $0x18] sm:$0xff] }
 0x22a   : > { %3038 = vmatprep.subr.bf16.mxu1 %v3175_v12 }
 0x22b   : > { %v1051_v54 = vpop.f32.mrb[2].mxu0 }
 0x22c   : > { %v2838_v55 = vpop.f32.mrb[3].mxu0 }
 0x22d   : > { %3040 = vmatpush3.bf16.msra.mxu1 %v3039_v52 }
 0x22e   : > { %3047 = vmatprep.subr.bf16.mxu1 %v3175_v12 }
 0x230   : > { %2826 = vmatmul.mubr.msk.f32.vlgmr.msra.gmra.mrb[2].mxu1 %vm657_vm0, %v3392_v56 }
 0x231   : > { %2847 = vmatprep.mubr.msk.f32.mxu1 %vm3176_vm1, %v3177_v15  ;;  %3049 = vmatpush3.bf16.msra.mxu1 %v3048_v24  ;;  %v3084_v24 = vpack.c.bf16 %v2656_v23, %v2655_v22  ;;  %v2066_v23 = vld [vmem:[%s3755_s13 + $0x30] sm:$0xff] }
 0x232   : > { %3050 = vmatprep.subr.bf16.mxu1 %v3175_v12 }
 0x235   : > { %3052 = vmatpush3.bf16.msra.mxu1 %v3051_v27 }
 0x236   : > { %3059 = vmatprep.subr.bf16.mxu1 %v3175_v12 }
 0x2fb   : > { %v859_v59 = vpop.f32.mrb[0].mxu1 }
 0x2fc   : > { %v860_v60 = vadd.f32 %v2630_v58, %v859_v59  ;;  %v2816_v61 = vpop.f32.mrb[1].mxu1  ;;  %v2646_v58 = vld [vmem:[%s3749_s7 + $0xa8] sm:$0xff] }
 0x2fd   : > { %v3075_v59 = vpack.c.bf16 %v2646_v58, %v2645_v57  ;;  %v2648_v61 = vld [vmem:[%s3749_s7 + $0xb8] sm:$0xff] }
 0x2fe   : > { %v864_v62 = vsel %vm863_vm3, %v860_v60, -inf }
 0x2ff   : > { %v865_v63 = vrot.slane %v864_v62, 4 }
 0x301   : > { %v866_v0 = vmax.f32 %v864_v62, %v865_v63  ;;  %v1210_v63 = vld [vmem:[%s3753_s11] sm:$0xff] }
 0x303   : > { %v867_v1 = vrot.slane %v866_v0, 2  ;;  %v978_v2 = vpop.f32.mrb[2].mxu1 }
 0x304   : > { %v1052_v3 = vadd.f32 %v1051_v54, %v978_v2  ;;  %v2827_v4 = vpop.f32.mrb[3].mxu1  ;;  %v2644_v54 = vld [vmem:[%s3749_s7 + $0x98] sm:$0xff]  ;;  %v1135_v2 = vld [vmem:[%s3752_s10] sm:$0x1] }
 0x305   : > { %v868_v5 = vmax.f32 %v866_v0, %v867_v1  ;;  %v3066_v55 = vpack.c.bf16 %v2644_v54, %v2643_v53  ;;  %v1211_v0 = vld [vmem:[%s3753_s11 + $0x8] sm:$0xff] }
 0x306   : > { %v3060_v1 = vpack.c.bf16 %v1211_v0, %v1210_v63  ;;  %v2638_v4 = vld [vmem:[%s3749_s7 + $0x68] sm:$0xff] }
 0x307   : > { %v869_v6 = vrot.slane %v868_v5, 1  ;;  %v2664_v53 = vld [vmem:[%s3749_s7 + $0xc8] sm:$0xff] }
 0x309   : > { %v870_v7 = vmax.f32 %v868_v5, %v869_v6 }
 0x30b   : > { %v871_v8 = vsub.f32 %v860_v60, %v870_v7  ;;  %v2647_v60 = vld [vmem:[%s3749_s7 + $0xb0] sm:$0xff] }
 0x30c   : > { %v3078_v62 = vpack.c.bf16 %v2648_v61, %v2647_v60  ;;  %v2665_v60 = vld [vmem:[%s3749_s7 + $0xd0] sm:$0xff]  ;;  %v2666_v61 = vld [vmem:[%s3749_s7 + $0xd8] sm:$0xff] }
 0x30d   : > { %v872_v9 = vmul.f32 1.442695, %v871_v8 }
 0x30f   : > { %3159 = vpow2.f32 %v872_v9 }
 0x319   : > { %v3160_v10 = vpop.eup %3159 }
 0x31a   : > { %v874_v11 = vsel %vm863_vm3, %v3160_v10, 0.0 }
 0x31b   : > { %v875_v13 = vrot.slane %v874_v11, 4 }
 0x31d   : > { %v876_v14 = vadd.f32 %v875_v13, %v874_v11  ;;  %v2640_v11 = vld [vmem:[%s3749_s7 + $0x78] sm:$0xff] }
 0x31f   : > { %v877_v16 = vrot.slane %v876_v14, 2 }
 0x321   : > { %v878_v17 = vadd.f32 %v877_v16, %v876_v14 }
 0x323   : > { %v879_v18 = vrot.slane %v878_v17, 1 }
 0x325   : > { %v880_v19 = vadd.f32 %v879_v18, %v878_v17 }
 0x327   : > { %3161 = vrcp.f32 %v880_v19  ;;  %v2653_v19 = vld [vmem:[%s3751_s9 + $0x20] sm:$0xff] }
 0x331   : > { %v3162_v20 = vpop.eup %3161 }
 0x332   : > { %v882_v21 = vmul.f32 %v3162_v20, %v3160_v10  ;;  %v2639_v10 = vld [vmem:[%s3749_s7 + $0x70] sm:$0xff]  ;;  %v2654_v20 = vld [vmem:[%s3751_s9 + $0x28] sm:$0xff] }
 0x333   : > { %v3072_v13 = vpack.c.bf16 %v2640_v11, %v2639_v10 }
 0x334   : > { %885 = vperm.xlu1 %3155, %v882_v21   ;;  %v3081_v21 = vpack.c.bf16 %v2654_v20, %v2653_v19  ;;  %v2065_v19 = vld [vmem:[%s3755_s13 + $0x28] sm:$0xff] }
 0x3b3   : > { %v886_v33 = vpop.permute.xlu1 %885 }
 0x3b4   : > { %v888_v34 = vmul.f32 %v886_v33, %v3343_v28  ;;  %v1134_v28 = vld [vmem:[%s3751_s9 + $0x18] sm:$0xff] }
 0x3b5   : > { %v3057_v43 = vpack.c.bf16 %v1134_v28, %v1133_v42  ;;  %v2671_v28 = vld [vmem:[%s3749_s7 + $0x100] sm:$0xff] }
 0x3b6   : > { %v889_v35 = vsel %vm657_vm0, %v888_v34, 0.0  ;;  %v2667_v34 = vld [vmem:[%s3749_s7 + $0xe0] sm:$0xff] }
 0x3b7   : > { %v890_v36 = vrot.slane %v889_v35, 4  ;;  %3058 = vmatpush3.bf16.msra.mxu0 %v3057_v43  ;;  %v2672_v43 = vld [vmem:[%s3749_s7 + $0x108] sm:$0xff] }
 0x3b8   : > { %3062 = vmatprep.subr.bf16.mxu0 %v3175_v12 }
 0x3b9   : > { %v891_v37 = vadd.f32 %v890_v36, %v889_v35  ;;  %v2668_v35 = vld [vmem:[%s3749_s7 + $0xe8] sm:$0xff] }
 0x3bb   : > { %v892_v38 = vrot.slane %v891_v37, 2 }
 0x3bd   : > { %v893_v39 = vadd.f32 %v892_v38, %v891_v37  ;;  %v3090_v37 = vpack.c.bf16 %v2668_v35, %v2667_v34  ;;  %v2686_v35 = vld [vmem:[%s3753_s11 + $0x28] sm:$0xff] }
 0x3bf   : > { %v894_v40 = vrot.slane %v893_v39, 1 }
 0x3c1   : > { %v3424_v41 = vadd.f32 %v894_v40, %v893_v39  ;;  %v2669_v39 = vld [vmem:[%s3749_s7 + $0xf0] sm:$0xff]  ;;  %v2670_v40 = vld [vmem:[%s3749_s7 + $0xf8] sm:$0xff] }
 0x3c2   : > { %v3093_v42 = vpack.c.bf16 %v2670_v40, %v2669_v39 }
 0x3c3   : > { %2848 = vmatmul.mubr.msk.f32.vlgmr.msra.gmra.mrb[4].mxu1 %vm657_vm0, %v3424_v41 }
 0x3c4   : > { %2865 = vmatprep.mubr.msk.f32.mxu1 %vm3176_vm1, %v3177_v15  ;;  %3061 = vmatpush3.bf16.msra.mxu1 %v3060_v1 }
 0x3c5   : > { %3068 = vmatprep.subr.bf16.mxu1 %v3175_v12 }
 0x496   : > { %v1124_v45 = vpop.f32.mrb[4].mxu1 }
 0x497   : > { %v1128_v46 = vadd.f32 %v1124_v45, %v1052_v3  ;;  %v2849_v47 = vpop.f32.mrb[5].mxu1  ;;  %v2637_v3 = vld [vmem:[%s3749_s7 + $0x60] sm:$0xff]  ;;  %v2673_v45 = vld [vmem:[%s3749_s7 + $0x110] sm:$0xff] }
 0x498   : > { %v3069_v8 = vpack.c.bf16 %v2638_v4, %v2637_v3  ;;  %v2679_v3 = vld [vmem:[%s3751_s9 + $0x40] sm:$0xff]  ;;  %v2680_v4 = vld [vmem:[%s3751_s9 + $0x48] sm:$0xff] }
 0x499   : > { %v1129_v50 = vadd.f32 %v1128_v46, %v908_v44  ;;  %v3102_v44 = vpack.c.bf16 %v2672_v43, %v2671_v28  ;;  %v2674_v46 = vld [vmem:[%s3749_s7 + $0x118] sm:$0xff] }
 0x49a   : > { %v3105_v47 = vpack.c.bf16 %v2674_v46, %v2673_v45  ;;  %v2063_v45 = vld [vmem:[%s3755_s13 + $0x18] sm:$0xff] }
 0x49b   : > { %v1130_v52 = vmax.f32 %v1129_v50, 0.0  ;;  %v3087_v50 = vpack.c.bf16 %v2660_v49, %v2659_v48 }
 0x49d   : > { %2859 = vmatmul.mubr.msk.f32.vlgmr.msra.gmra.mrb[4].mxu0 %vm657_vm0, %v1130_v52  ;;  %v2663_v52 = vld [vmem:[%s3749_s7 + $0xc0] sm:$0xff] }
 0x49e   : > { %3064 = vmatpush3.bf16.msra.mxu0 %v3063_v51  ;;  %2876 = vmatprep.mubr.msk.f32.mxu0 %vm3176_vm1, %v3177_v15  ;;  %v2657_v51 = vld [vmem:[%s3752_s10 + $0x1] sm:$0x1]  ;;  %v3096_v58 = vpack.c.bf16 %v2664_v53, %v2663_v52  ;;  %v2289_v52 = vld [vmem:[%s3757_s15 + $0x8] sm:$0xff] }
 0x49f   : > { %3065 = vmatprep.subr.bf16.mxu0 %v3175_v12 }
 0x4a2   : > { %3067 = vmatpush3.bf16.msra.mxu0 %v3066_v55 }
 0x4a3   : > { %3074 = vmatprep.subr.bf16.mxu0 %v3175_v12 }
 0x4a5   : > { %2877 = vmatmul.mubr.msk.f32.vlgmr.msra.gmra.mrb[6].mxu0 %vm657_vm0, %v3392_v56 }
 0x4a6   : > { %3076 = vmatpush3.bf16.msra.mxu0 %v3075_v59  ;;  %2898 = vmatprep.mubr.msk.f32.mxu0 %vm3176_vm1, %v3177_v15 }
 0x4a7   : > { %3077 = vmatprep.subr.bf16.mxu0 %v3175_v12 }
 0x4aa   : > { %3079 = vmatpush3.bf16.msra.mxu0 %v3078_v62  ;;  %v3099_v62 = vpack.c.bf16 %v2666_v61, %v2665_v60 }
 0x4ab   : > { %3086 = vmatprep.subr.bf16.mxu0 %v3175_v12 }
 0x4ad   : > { %2899 = vmatmul.mubr.msk.f32.vlgmr.msra.gmra.mrb[8].mxu0 %vm657_vm0, %v3424_v41 }
 0x4ae   : > { %2916 = vmatprep.mubr.msk.f32.mxu0 %vm3176_vm1, %v3177_v15  ;;  %3088 = vmatpush3.bf16.msra.mxu0 %v3087_v50 }
 0x4af   : > { %3095 = vmatprep.subr.bf16.mxu0 %v3175_v12 }
 0x570   : > { %v1205_v5 = vpop.f32.mrb[4].mxu0 }
 0x571   : > { %v1206_v6 = vadd.f32 %v1205_v5, %v1135_v2  ;;  %v2860_v7 = vpop.f32.mrb[5].mxu0  ;;  %v3108_v5 = vpack.c.bf16 %v2680_v4, %v2679_v3  ;;  %v2370_v3 = vld [vmem:[%s3759_s17 + $0x8] sm:$0xff] }
 0x572   : > { %v2682_v7 = vld [vmem:[%s3751_s9 + $0x58] sm:$0xff] }
 0x573   : > { %v1209_v9 = vmax.f32 %v1206_v6, 0.0  ;;  %v2681_v6 = vld [vmem:[%s3751_s9 + $0x50] sm:$0xff] }
 0x575   : > { %2866 = vmatmul.mubr.msk.f32.vlgmr.msra.gmra.mrb[6].mxu1 %vm789_vm2, %v1209_v9 }
 0x576   : > { %3070 = vmatpush3.bf16.msra.mxu1 %v3069_v8  ;;  %2887 = vmatprep.mubr.msk.f32.mxu1 %vm3176_vm1, %v3177_v15  ;;  %v3111_v8 = vpack.c.bf16 %v2682_v7, %v2681_v6 }
 0x577   : > { %3071 = vmatprep.subr.bf16.mxu1 %v3175_v12 }
 0x578   : > { %v1367_v14 = vpop.f32.mrb[6].mxu0 }
 0x579   : > { %v2878_v16 = vpop.f32.mrb[7].mxu0 }
 0x57a   : > { %3073 = vmatpush3.bf16.msra.mxu1 %v3072_v13  ;;  %v2675_v16 = vld [vmem:[%s3750_s8 + $0x2] sm:$0x1] }
 0x57b   : > { %3080 = vmatprep.subr.bf16.mxu1 %v3175_v12 }
 0x57d   : > { %2888 = vmatmul.mubr.msk.f32.vlgmr.msra.gmra.mrb[8].mxu1 %vm657_vm0, %v3357_v32 }
 0x57e   : > { %2909 = vmatprep.mubr.msk.f32.mxu1 %vm3176_vm1, %v3177_v15  ;;  %3082 = vmatpush3.bf16.msra.mxu1 %v3081_v21 }
 0x57f   : > { %3083 = vmatprep.subr.bf16.mxu1 %v3175_v12 }
 0x580   : > { %v1507_v17 = vpop.f32.mrb[8].mxu0 }
 0x581   : > { %v2900_v18 = vpop.f32.mrb[9].mxu0 }
 0x582   : > { %3085 = vmatpush3.bf16.msra.mxu1 %v3084_v24  ;;  %v2064_v18 = vld [vmem:[%s3755_s13 + $0x20] sm:$0xff]  ;;  %v2067_v24 = vld [vmem:[%s3755_s13 + $0x38] sm:$0xff] }
 0x583   : > { %3089 = vmatprep.subr.bf16.mxu1 %v3175_v12  ;;  %v3117_v21 = vpack.c.bf16 %v2065_v19, %v2064_v18 }
 0x648   : > { %v3524_v25 = vpop.f32.mrb[6].mxu1 }
 0x649   : > { %v2867_v26 = vpop.f32.mrb[7].mxu1 }
 0x64a   : > { %v3120_v26 = vpack.c.bf16 %v2067_v24, %v2066_v23  ;;  %v1212_v24 = vld [vmem:[%s3754_s12] sm:$0x1] }
 0x650   : > { %v1437_v27 = vpop.f32.mrb[8].mxu1 }
 0x651   : > { %v1438_v29 = vadd.f32 %v1437_v27, %v1367_v14  ;;  %v2889_v30 = vpop.f32.mrb[9].mxu1  ;;  %v2068_v27 = vld [vmem:[%s3755_s13 + $0x40] sm:$0xff] }
 0x653   : > { %v1511_v33 = vadd.f32 %v1507_v17, %v1438_v29  ;;  %v2069_v29 = vld [vmem:[%s3755_s13 + $0x48] sm:$0xff] }
 0x654   : > { %v3129_v30 = vpack.c.bf16 %v2069_v29, %v2068_v27  ;;  %v1283_v27 = vadd.f32 %v3524_v25, %v1212_v24 }
 0x655   : > { %v1512_v36 = vadd.f32 %v2649_v31, %v1511_v33  ;;  %v2070_v31 = vld [vmem:[%s3755_s13 + $0x50] sm:$0xff]  ;;  %v2071_v33 = vld [vmem:[%s3755_s13 + $0x58] sm:$0xff] }
 0x656   : > { %v3132_v34 = vpack.c.bf16 %v2071_v33, %v2070_v31  ;;  %v2687_v33 = vld [vmem:[%s3754_s12 + $0x2] sm:$0x1] }
 0x657   : > { %v1513_v38 = vmax.f32 %v1512_v36, 0.0 }
 0x659   : > { %2910 = vmatmul.mubr.msk.f32.vlgmr.msra.gmra.mrb[10].mxu1 %vm657_vm0, %v1513_v38  ;;  %v2061_v38 = vld [vmem:[%s3755_s13 + $0x8] sm:$0xff] }
 0x65a   : > { %3091 = vmatpush3.bf16.msra.mxu1 %v3090_v37  ;;  %2927 = vmatprep.mubr.msk.f32.mxu1 %vm3176_vm1, %v3177_v15  ;;  %v2683_v37 = vld [vmem:[%s3752_s10 + $0x2] sm:$0x1] }
 0x65b   : > { %3092 = vmatprep.subr.bf16.mxu1 %v3175_v12 }
 0x65e   : > { %3094 = vmatpush3.bf16.msra.mxu1 %v3093_v42 }
 0x65f   : > { %3101 = vmatprep.subr.bf16.mxu1 %v3175_v12 }
 0x661   : > { %2928 = vmatmul.mubr.msk.f32.vlgmr.msra.gmra.mrb[12].mxu1 %vm657_vm0, %v3392_v56 }
 0x662   : > { %3103 = vmatpush3.bf16.msra.mxu1 %v3102_v44  ;;  %2949 = vmatprep.mubr.msk.f32.mxu1 %vm3176_vm1, %v3177_v15  ;;  %v2062_v44 = vld [vmem:[%s3755_s13 + $0x10] sm:$0xff] }
 0x663   : > { %3104 = vmatprep.subr.bf16.mxu1 %v3175_v12  ;;  %v3126_v46 = vpack.c.bf16 %v2063_v45, %v2062_v44 }
 0x666   : > { %3106 = vmatpush3.bf16.msra.mxu1 %v3105_v47 }
 0x667   : > { %3113 = vmatprep.subr.bf16.mxu1 %v3175_v12 }
 0x669   : > { %2950 = vmatmul.mubr.msk.f32.vlgmr.msra.gmra.mrb[14].mxu1 %vm657_vm0, %v3424_v41 }
 0x66a   : > { %2967 = vmatprep.mubr.msk.f32.mxu1 %vm3176_vm1, %v3177_v15 }
 0x72c   : > { %v1590_v54 = vpop.f32.mrb[10].mxu1 }
 0x72d   : > { %v1591_v55 = vadd.f32 %v2657_v51, %v1590_v54  ;;  %v2911_v57 = vpop.f32.mrb[11].mxu1  ;;  %v2288_v51 = vld [vmem:[%s3757_s15] sm:$0xff]  ;;  %v2291_v54 = vld [vmem:[%s3757_s15 + $0x18] sm:$0xff] }
 0x72e   : > { %v3135_v53 = vpack.c.bf16 %v2289_v52, %v2288_v51 }
 0x72f   : > { %v1594_v59 = vmax.f32 %v1591_v55, 0.0 }
 0x731   : > { %2917 = vmatmul.mubr.msk.f32.vlgmr.msra.gmra.mrb[10].mxu0 %vm789_vm2, %v1594_v59 }
 0x732   : > { %3097 = vmatpush3.bf16.msra.mxu0 %v3096_v58  ;;  %2938 = vmatprep.mubr.msk.f32.mxu0 %vm3176_vm1, %v3177_v15 }
 0x733   : > { %3098 = vmatprep.subr.bf16.mxu0 %v3175_v12 }
 0x734   : > { %v1754_v63 = vpop.f32.mrb[12].mxu1 }
 0x735   : > { %v2929_v0 = vpop.f32.mrb[13].mxu1 }
 0x736   : > { %3100 = vmatpush3.bf16.msra.mxu0 %v3099_v62 }
 0x737   : > { %3107 = vmatprep.subr.bf16.mxu0 %v3175_v12 }
 0x739   : > { %2939 = vmatmul.mubr.msk.f32.vlgmr.msra.gmra.mrb[12].mxu0 %vm657_vm0, %v3357_v32 }
 0x73a   : > { %2960 = vmatprep.mubr.msk.f32.mxu0 %vm3176_vm1, %v3177_v15  ;;  %3109 = vmatpush3.bf16.msra.mxu0 %v3108_v5  ;;  %v2292_v5 = vld [vmem:[%s3758_s16] sm:$0x1] }
 0x73b   : > { %3110 = vmatprep.subr.bf16.mxu0 %v3175_v12 }
 0x73c   : > { %v1894_v1 = vpop.f32.mrb[14].mxu1 }
 0x73d   : > { %v2951_v2 = vpop.f32.mrb[15].mxu1 }
 0x73e   : > { %3112 = vmatpush3.bf16.msra.mxu0 %v3111_v8  ;;  %v2369_v2 = vld [vmem:[%s3759_s17] sm:$0xff] }
 0x73f   : > { %3116 = vmatprep.subr.bf16.mxu0 %v3175_v12  ;;  %v3141_v4 = vpack.c.bf16 %v2370_v3, %v2369_v2 }
 0x804   : > { %v3613_v9 = vpop.f32.mrb[10].mxu0 }
 0x805   : > { %v2918_v10 = vpop.f32.mrb[11].mxu0 }
 0x80c   : > { %v1824_v11 = vpop.f32.mrb[12].mxu0 }
 0x80d   : > { %v1825_v13 = vadd.f32 %v1824_v11, %v1754_v63  ;;  %v2940_v14 = vpop.f32.mrb[13].mxu0  ;;  %v2448_v11 = vld [vmem:[%s3761_s19] sm:$0xff] }
 0x80f   : > { %v1898_v17 = vadd.f32 %v1894_v1, %v1825_v13  ;;  %v2371_v13 = vld [vmem:[%s3760_s18] sm:$0x1] }
 0x811   : > { %v1899_v20 = vadd.f32 %v2675_v16, %v1898_v17 }
 0x813   : > { %v1900_v22 = vmax.f32 %v1899_v20, 0.0  ;;  %v2449_v20 = vld [vmem:[#allocation3] sm:$0x1] }
 0x815   : > { %2961 = vmatmul.mubr.msk.f32.vlgmr.msra.gmra.mrb[14].mxu0 %vm657_vm0, %v1900_v22 }
 0x816   : > { %3118 = vmatpush3.bf16.msra.mxu0 %v3117_v21  ;;  %2978 = vmatprep.mubr.msk.f32.mxu0 %vm3176_vm1, %v3177_v15 }
 0x817   : > { %3119 = vmatprep.subr.bf16.mxu0 %v3175_v12 }
 0x81a   : > { %3121 = vmatpush3.bf16.msra.mxu0 %v3120_v26 }
 0x81b   : > { %3128 = vmatprep.subr.bf16.mxu0 %v3175_v12 }
 0x81d   : > { %2979 = vmatmul.mubr.msk.f32.vlgmr.msra.gmra.mrb[16].mxu0 %vm657_vm0, %v3392_v56  ;;  %v2685_v56 = vld [vmem:[%s3753_s11 + $0x20] sm:$0xff] }
 0x81e   : > { %3130 = vmatpush3.bf16.msra.mxu0 %v3129_v30  ;;  %3000 = vmatprep.mubr.msk.f32.mxu0 %vm3176_vm1, %v3177_v15  ;;  %v3114_v36 = vpack.c.bf16 %v2686_v35, %v2685_v56  ;;  %v2661_v30 = vld [vmem:[%s3754_s12 + $0x1] sm:$0x1] }
 0x81f   : > { %3131 = vmatprep.subr.bf16.mxu0 %v3175_v12  ;;  %v1670_v31 = vadd.f32 %v2661_v30, %v3613_v9 }
 0x820   : > { %3115 = vmatpush3.bf16.msra.mxu1 %v3114_v36 }
 0x821   : > { %3122 = vmatprep.subr.bf16.mxu1 %v3175_v12 }
 0x822   : > { %3133 = vmatpush3.bf16.msra.mxu0 %v3132_v34 }
 0x823   : > { %3140 = vmatprep.subr.bf16.mxu0 %v3175_v12 }
 0x825   : > { %3001 = vmatmul.mubr.msk.f32.vlgmr.msra.gmra.mrb[18].mxu0 %vm657_vm0, %v3424_v41  ;;  %v2060_v41 = vld [vmem:[%s3755_s13] sm:$0xff] }
 0x826   : > { %3018 = vmatprep.mubr.msk.f32.mxu0 %vm3176_vm1, %v3177_v15  ;;  %v3123_v28 = vpack.c.bf16 %v2061_v38, %v2060_v41  ;;  %3142 = vmatpush3.bf16.msra.mxu0 %v3141_v4 }
 0x8e8   : > { %v1977_v39 = vpop.f32.mrb[14].mxu0 }
 0x8e9   : > { %v1978_v40 = vadd.f32 %v2683_v37, %v1977_v39  ;;  %v2962_v42 = vpop.f32.mrb[15].mxu0  ;;  %v2530_v37 = vlaneseq }
 0x8eb   : > { %v1981_v43 = vmax.f32 %v1978_v40, 0.0  ;;  %v2531_v38 = vand.u32 127, %v2530_v37 }
 0x8ed   : > { %2968 = vmatmul.mubr.msk.f32.vlgmr.msra.gmra.mrb[16].mxu1 %vm789_vm2, %v1981_v43  ;;  %vm2532_vm8 = vcmp.eq.s32.totalorder %v2531_v38, 0  ;;  %vm2539_vm9 = vcmp.eq.s32.totalorder %v2531_v38, 1  ;;  %vm2547_vm10 = vcmp.eq.s32.totalorder %v2531_v38, 2  ;;  %vm2555_vm11 = vcmp.eq.s32.totalorder %v2531_v38, 3 }
 0x8ee   : > { %3124 = vmatpush3.bf16.msra.mxu1 %v3123_v28  ;;  %2989 = vmatprep.mubr.msk.f32.mxu1 %vm3176_vm1, %v3177_v15  ;;  %vm2563_vm12 = vcmp.eq.s32.totalorder %v2531_v38, 4 }
 0x8ef   : > { %3125 = vmatprep.subr.bf16.mxu1 %v3175_v12 }
 0x8f0   : > { %v2139_v47 = vpop.f32.mrb[16].mxu0 }
 0x8f1   : > { %v2980_v48 = vpop.f32.mrb[17].mxu0 }
 0x8f2   : > { %3127 = vmatpush3.bf16.msra.mxu1 %v3126_v46 }
 0x8f3   : > { %3134 = vmatprep.subr.bf16.mxu1 %v3175_v12 }
 0x8f5   : > { %2990 = vmatmul.mubr.msk.f32.vlgmr.msra.gmra.mrb[18].mxu1 %vm657_vm0, %v3357_v32  ;;  %v2290_v32 = vld [vmem:[%s3757_s15 + $0x10] sm:$0xff] }
 0x8f6   : > { %3011 = vmatprep.mubr.msk.f32.mxu1 %vm3176_vm1, %v3177_v15  ;;  %3136 = vmatpush3.bf16.msra.mxu1 %v3135_v53  ;;  %v3138_v55 = vpack.c.bf16 %v2291_v54, %v2290_v32 }
 0x8f7   : > { %3137 = vmatprep.subr.bf16.mxu1 %v3175_v12  ;;  %v2072_v12 = vld [vmem:[%s3756_s14] sm:$0x1] }
 0x8f8   : > { %v2279_v49 = vpop.f32.mrb[18].mxu0 }
 0x8f9   : > { %v3002_v50 = vpop.f32.mrb[19].mxu0 }
 0x8fa   : > { %3139 = vmatpush3.bf16.msra.mxu1 %v3138_v55 }
 0x8fb   : > { %3021 = vmatprep.subr.mxu1 %v3177_v15 }
 0x9c0   : > { %v2056_v57 = vpop.f32.mrb[16].mxu1 }
 0x9c1   : > { %v2969_v58 = vpop.f32.mrb[17].mxu1  ;;  %v2057_v34 = vadd.f32 %v2687_v33, %v2056_v57 }
 0x9c8   : > { %v2209_v59 = vpop.f32.mrb[18].mxu1 }
 0x9c9   : > { %v2210_v60 = vadd.f32 %v2209_v59, %v2139_v47  ;;  %v2991_v61 = vpop.f32.mrb[19].mxu1 }
 0x9cb   : > { %v2283_v62 = vadd.f32 %v2279_v49, %v2210_v60 }
 0x9cd   : > { %v2284_v63 = vadd.f32 %v2283_v62, %v2072_v12 }
 0x9cf   : > { %v2286_v0 = vmul.f32 0.1, %v2284_v63  ;;  %vm2285_vm4 = vcmp.gt.f32.partialorder %v2284_v63, 0.0 }
 0x9d1   : > { %v2287_v1 = vsel %vm2285_vm4, %v2284_v63, %v2286_v0 }
 0x9d2   : > { %3012 = vmatmul.mubr.msk.f32.vlgmr.msra.gmra.mrb[20].mxu1 %vm657_vm0, %v2287_v1 }
 0x9d3   : > { %3023 = vmatprep.mubr.msk.f32.mxu1 %vm3176_vm1, %v3177_v15  ;;  %3022 = vmatpush3.msra.mxu1 %v2448_v11 }
 0xaa5   : > { %v2362_v6 = vpop.f32.mrb[20].mxu1 }
 0xaa6   : > { %v2363_v7 = vadd.f32 %v2362_v6, %v2292_v5  ;;  %v3013_v8 = vpop.f32.mrb[21].mxu1 }
 0xaa8   : > { %vm2366_vm5 = vcmp.gt.f32.partialorder %v2363_v7, 0.0  ;;  %v2367_v10 = vmul.f32 0.1, %v2363_v7 }
 0xaaa   : > { %v2368_v15 = vsel %vm2366_vm5, %v2363_v7, %v2367_v10 }
 0xaab   : > { %3019 = vmatmul.mubr.msk.f32.vlgmr.msra.gmra.mrb[20].mxu0 %vm789_vm2, %v2368_v15 }
 0xb7e   : > { %v2441_v14 = vpop.f32.mrb[20].mxu0 }
 0xb7f   : > { %v2442_v16 = vadd.f32 %v2441_v14, %v2371_v13  ;;  %v3020_v17 = vpop.f32.mrb[21].mxu0 }
 0xb81   : > { %vm2445_vm6 = vcmp.gt.f32.partialorder %v2442_v16, 0.0  ;;  %v2446_v18 = vmul.f32 0.1, %v2442_v16 }
 0xb83   : > { %v2447_v19 = vsel %vm2445_vm6, %v2442_v16, %v2446_v18 }
 0xb84   : > { %3024 = vmatmul.mubr.msk.f32.vlgmr.msra.gmra.mrb[22].mxu1 %vm2450_vm7, %v2447_v19 }
 0xc57   : > { %v2520_v21 = vpop.f32.mrb[22].mxu1 }
 0xc58   : > { %v2521_v22 = vadd.f32 %v2520_v21, %v2449_v20  ;;  %v3025_v23 = vpop.f32.mrb[23].mxu1 }
 0xc5a   : > { %v2524_v26 = vsub.f32 0.0, %v2521_v22  ;;  %2535 = vperm.xlu1 %3155, %v2521_v22  }
 0xc5c   : > { %v2525_v29 = vmul.f32 1.442695, %v2524_v26 }
 0xc5e   : > { %3163 = vpow2.f32 %v2525_v29  ;;  %2550 = vperm.xlu1 %3155, %v1283_v27  }
 0xc62   : > { %2558 = vperm.xlu1 %3155, %v1670_v31  }
 0xc66   : > { %2566 = vperm.xlu1 %3155, %v2057_v34  }
 0xc68   : > { %v3164_v56 = vpop.eup %3163 }
 0xc69   : > { %v2527_v35 = vadd.f32 1.0, %v3164_v56 }
 0xc6b   : > { %3165 = vrcp.f32 %v2527_v35 }
 0xc75   : > { %v3166_v25 = vpop.eup %3165 }
 0xc76   : > { %2542 = vperm.xlu0 %3156, %v3166_v25  }
 0xcd9   : > { %v2536_v36 = vpop.permute.xlu1 %2535 }
 0xcda   : > { %v2538_v40 = vsel %vm2532_vm8, %v2536_v36, 0.0 }
 0xcdd   : > { %v2551_v41 = vpop.permute.xlu1 %2550 }
 0xcde   : > { %v2553_v43 = vsel %vm2547_vm10, %v2551_v41, 0.0 }
 0xce1   : > { %v2559_v39 = vpop.permute.xlu1 %2558 }
 0xce2   : > { %v2561_v46 = vsel %vm2555_vm11, %v2559_v39, 0.0 }
 0xce5   : > { %v2567_v44 = vpop.permute.xlu1 %2566 }
 0xce6   : > { %v2569_v48 = vsel %vm2563_vm12, %v2567_v44, 0.0 }
 0xcf5   : > { %v2543_v9 = vpop.permute.xlu0 %2542 }
 0xcf6   : > { %v2545_v42 = vsel %vm2539_vm9, %v2543_v9, 0.0 }
 0xcf7   : > { %v2546_v28 = vadd.f32 %v2545_v42, %v2538_v40 }
 0xcf9   : > { %v2554_v45 = vadd.f32 %v2553_v43, %v2546_v28 }
 0xcfb   : > { %v2562_v47 = vadd.f32 %v2561_v46, %v2554_v45 }
 0xcfd   : > { %v2570_v49 = vadd.f32 %v2569_v48, %v2562_v47 }
 0xcff   : > { %2572 = vst.msk [vmem:[%s653_s29] sm:$0x1] %vm2571_vm13, %v2570_v49 }
 0xd00 PF: > { %s35_s3 = sadd.s32 1, %s3173_s3  }
 0xd01   : > { %p32_p4 = scmp.ge.s32.totalorder %s35_s3, 4  }
 0xd03   :  { %34 = sbr.rel (!%p32_p4) target bundleno = 7 (0x7), region = 146 }

</bundles_post_ra>
